<compile_context>
chip_gen: v7x
topology: tpu7x:2x2x1
jax: 0.10.0
libtpu: 0.0.40
codegen_flags: <defaults>
</compile_context>

<pallas_src>
import jax
import jax.numpy as jnp
import numpy as np
from jax.experimental import pallas as pl
from jax.experimental.pallas import tpu as pltpu

NUM_LAYERS = 5
BN_EPS = 1e-5
LANE = 128


def _round_up(x, m):
    return ((x + m - 1) // m) * m


def _encoder_kernel(a_ref, x_ref, w1_ref, b1_ref, w2_ref, b2_ref,
                    gamma_ref, beta_ref, xs_ref):
    """One grid step = full 5-layer encoder for one graph (everything in VMEM).

    a_ref:     (1, N, N)      Ahat = adjacency + identity for this graph
    x_ref:     (1, N, Dp)     input node features (lane-padded to Dp=128)
    w1_ref:    (L, Dp, Dp)    first linear of each layer's MLP (zero-padded)
    b1_ref:    (L, 1, Dp)
    w2_ref:    (L, Dp, Dp)
    b2_ref:    (L, 1, Dp)
    gamma_ref: (L, 1, Dp)     batchnorm scale  (zero in padded lanes)
    beta_ref:  (L, 1, Dp)     batchnorm shift  (zero in padded lanes)
    xs_ref:    (1, L, N, Dp)  per-layer outputs (xs[-1] is the final x)
    """
    a = a_ref[0]                         # (N, N)
    x = x_ref[0]                         # (N, Dp)
    num_layers = w1_ref.shape[0]
    n_nodes = x.shape[0]
    inv_n = 1.0 / n_nodes

    for i in range(num_layers):          # static unroll (L small & fixed)
        # GIN aggregation with eps=0:  x_i + sum_{j->i} x_j  ==  Ahat @ x
        agg = jnp.dot(a, x, preferred_element_type=jnp.float32)

        # GIN MLP: Linear -> ReLU -> Linear
        h = jnp.dot(agg, w1_ref[i], preferred_element_type=jnp.float32) + b1_ref[i]
        h = jnp.maximum(h, 0.0)
        h = jnp.dot(h, w2_ref[i], preferred_element_type=jnp.float32) + b2_ref[i]

        # Outer F.relu(conv(x))
        h = jnp.maximum(h, 0.0)

        # BatchNorm1d (train-mode, biased variance) -- fused single-pass stats.
        s = jnp.sum(h, axis=0, keepdims=True)            # (1, Dp)
        ss = jnp.sum(h * h, axis=0, keepdims=True)       # (1, Dp)
        mean = s * inv_n
        var = ss * inv_n - mean * mean
        scale = jax.lax.rsqrt(var + BN_EPS) * gamma_ref[i]   # (1, Dp) row math
        shift = beta_ref[i] - mean * scale                   # (1, Dp) row math
        h = h * scale + shift                                # one full-tile FMA

        xs_ref[0, i] = h                  # lane-dense (Dp = 128) unmasked store
        x = h


def _pad_lanes(a, target):
    """Zero-pad the last dim of `a` to `target` lanes."""
    pad = target - a.shape[-1]
    if pad == 0:
        return a
    widths = [(0, 0)] * (a.ndim - 1) + [(0, pad)]
    return jnp.pad(a, widths)


def _pad_lanes2(a, t_rows, t_cols):
    """Zero-pad the last two dims of `a`."""
    pr, pc = t_rows - a.shape[-2], t_cols - a.shape[-1]
    if pr == 0 and pc == 0:
        return a
    widths = [(0, 0)] * (a.ndim - 2) + [(0, pr), (0, pc)]
    return jnp.pad(a, widths)


def encoder_forward_batched(xb, ab, params):
    """Run the encoder on B independent graphs in one pallas_call.

    xb: (B, N, Din) node features per graph
    ab: (B, N, N)   dense Ahat = A + I per graph
    Returns (x_final (B, N, D), xs list of L arrays each (B, N, D)).
    """
    B, N, d_in = xb.shape
    L = params["w1"].shape[0]
    d_out = params["w2"].shape[-1]
    Dp = _round_up(max(d_in, d_out), LANE)     # lane-dense feature width

    # Lane-pad everything in the wrapper (pad columns stay identically zero
    # through all layers because padded gamma/beta are zero).
    x_p = _pad_lanes(xb.astype(jnp.float32), Dp)
    w1_p = _pad_lanes2(params["w1"], Dp, Dp)
    w2_p = _pad_lanes2(params["w2"], Dp, Dp)
    b1_p = _pad_lanes(params["b1"], Dp)
    b2_p = _pad_lanes(params["b2"], Dp)
    g_p = _pad_lanes(params["gamma"], Dp)
    bt_p = _pad_lanes(params["beta"], Dp)
    a_f = ab.astype(jnp.float32)

    # Advisory cost estimate (per review): matmul flops + elementwise, f32 bytes.
    flops_per_graph = L * (2 * N * N * Dp + 4 * N * Dp * Dp + 10 * N * Dp)
    bytes_in = 4 * int(a_f.size + x_p.size + w1_p.size + w2_p.size
                       + b1_p.size + b2_p.size + g_p.size + bt_p.size)
    bytes_out = 4 * B * L * N * Dp
    cost = pl.CostEstimate(flops=B * flops_per_graph,
                           transcendentals=B * L * Dp,
                           bytes_accessed=bytes_in + bytes_out)

    graph_spec = lambda shape: pl.BlockSpec(shape, lambda b: (b,) + (0,) * (len(shape) - 1))
    shared_spec = lambda shape: pl.BlockSpec(shape, lambda b: (0,) * len(shape))

    xs_p = pl.pallas_call(
        _encoder_kernel,
        out_shape=jax.ShapeDtypeStruct((B, L, N, Dp), jnp.float32),
        grid_spec=pltpu.PrefetchScalarGridSpec(
            num_scalar_prefetch=0,
            grid=(B,),
            in_specs=[
                graph_spec((1, N, N)),          # Ahat for graph b
                graph_spec((1, N, Dp)),         # x for graph b
                shared_spec((L, Dp, Dp)),       # w1 (resident across grid steps)
                shared_spec((L, 1, Dp)),        # b1
                shared_spec((L, Dp, Dp)),       # w2
                shared_spec((L, 1, Dp)),        # b2
                shared_spec((L, 1, Dp)),        # gamma
                shared_spec((L, 1, Dp)),        # beta
            ],
            out_specs=pl.BlockSpec((1, L, N, Dp), lambda b: (b, 0, 0, 0)),
        ),
        compiler_params=pltpu.CompilerParams(
            dimension_semantics=("parallel",),       # shard graphs across TCs (v7x)
            vmem_limit_bytes=32 * 1024 * 1024,
        ),
        cost_estimate=cost,
    )(a_f, x_p, w1_p, b1_p, w2_p, b2_p, g_p, bt_p)

    xs = xs_p[..., :d_out]                          # strip lane padding
    xs_list = [xs[:, i] for i in range(L)]
    return xs_list[-1], xs_list


def _dense_ahat(edge_index, n_nodes):
    """Dense Ahat = A + I from an edge_index (2, E)."""
    src, dst = edge_index[0], edge_index[1]
    a = jnp.zeros((n_nodes, n_nodes), jnp.float32).at[dst, src].add(1.0)
    return a + jnp.eye(n_nodes, dtype=jnp.float32)


def encoder_forward(x, edge_index, batch, params):
    """JAX wrapper mirroring Encoder.forward(x, edge_index, batch).

    `batch` is accepted for signature parity but (as in the PyTorch module's
    forward) is unused.
    """
    del batch
    n_nodes = x.shape[0]
    a = _dense_ahat(edge_index, n_nodes)
    x_final, xs_list = encoder_forward_batched(x[None], a[None], params)
    return x_final[0], [h[0] for h in xs_list]


def init_params(key, dim_in, dim_out, num_layers):
    """Deterministic synthetic parameters (shapes match the PyTorch module)."""
    assert dim_in == dim_out, "stacked-weight layout assumes dim_in == dim_out"
    ks = jax.random.split(key, 4 * num_layers)
    w1, b1, w2, b2 = [], [], [], []
    for i in range(num_layers):
        d_in = dim_in if i == 0 else dim_out
        s1 = 1.0 / np.sqrt(d_in)
        s2 = 1.0 / np.sqrt(dim_out)
        w1.append(jax.random.uniform(ks[4 * i + 0], (d_in, dim_out),
                                     jnp.float32, -s1, s1))
        b1.append(jax.random.uniform(ks[4 * i + 1], (1, dim_out),
                                     jnp.float32, -s1, s1))
        w2.append(jax.random.uniform(ks[4 * i + 2], (dim_out, dim_out),
                                     jnp.float32, -s2, s2))
        b2.append(jax.random.uniform(ks[4 * i + 3], (1, dim_out),
                                     jnp.float32, -s2, s2))
    return {
        "w1": jnp.stack(w1),                       # (L, Din, D)  (Din == D)
        "b1": jnp.stack(b1),                       # (L, 1, D)
        "w2": jnp.stack(w2),                       # (L, D, D)
        "b2": jnp.stack(b2),                       # (L, 1, D)
        "gamma": jnp.ones((num_layers, 1, dim_out), jnp.float32),
        "beta": jnp.zeros((num_layers, 1, dim_out), jnp.float32),
    }


def _reference_forward(x, edge_index, params):
    """Pure-JAX reference (single graph) for correctness checking."""
    n = x.shape[0]
    a = jnp.zeros((n, n), jnp.float32).at[edge_index[1], edge_index[0]].add(1.0)
    a = a + jnp.eye(n, dtype=jnp.float32)
    xs = []
    for i in range(params["w1"].shape[0]):
        agg = a @ x
        h = jnp.maximum(agg @ params["w1"][i] + params["b1"][i], 0.0)
        h = h @ params["w2"][i] + params["b2"][i]
        h = jnp.maximum(h, 0.0)
        mean = jnp.mean(h, axis=0, keepdims=True)
        var = jnp.mean((h - mean) ** 2, axis=0, keepdims=True)
        h = (h - mean) / jnp.sqrt(var + BN_EPS) * params["gamma"][i] + params["beta"][i]
        xs.append(h)
        x = h
    return xs[-1], xs


if __name__ == "__main__":
    dim_in = 32
    dim_out = 32
    n_nodes = 16
    n_graphs = 8                      # batched grid axis (parallel across TCs)

    key = jax.random.PRNGKey(0)
    k_x, k_p = jax.random.split(key)
    params = init_params(k_p, dim_in, dim_out, NUM_LAYERS)

    # B independent graphs: graph b is a bidirectional ring with stride b+1.
    xb = jax.random.normal(k_x, (n_graphs, n_nodes, dim_in), jnp.float32)
    edge_indices = []
    for b in range(n_graphs):
        stride = (b % (n_nodes - 1)) + 1
        src = np.arange(n_nodes, dtype=np.int32)
        dst = (src + stride) % n_nodes
        ei = np.stack([np.concatenate([src, dst]), np.concatenate([dst, src])])
        edge_indices.append(jnp.asarray(ei, dtype=jnp.int32))
    ab = jnp.stack([_dense_ahat(ei, n_nodes) for ei in edge_indices])

    # Batched path: one pallas_call, grid over graphs.
    x_out, xs_out = encoder_forward_batched(xb, ab, params)
    jax.block_until_ready(x_out)

    for b in range(n_graphs):
        ref_x, ref_xs = _reference_forward(xb[b], edge_indices[b], params)
        assert np.allclose(np.asarray(x_out[b]), np.asarray(ref_x),
                           atol=1e-4, rtol=1e-4)
        for got, want in zip([layer[b] for layer in xs_out], ref_xs):
            assert np.allclose(np.asarray(got), np.asarray(want),
                               atol=1e-4, rtol=1e-4)

    # Module-parity single-graph API (same kernel, B=1).
    batch_vec = jnp.zeros((n_nodes,), jnp.int32)
    out1_x, out1_xs = encoder_forward(xb[0], edge_indices[0], batch_vec, params)
    jax.block_until_ready(out1_x)
    ref1_x, ref1_xs = _reference_forward(xb[0], edge_indices[0], params)
    assert np.allclose(np.asarray(out1_x), np.asarray(ref1_x), atol=1e-4, rtol=1e-4)
    for got, want in zip(out1_xs, ref1_xs):
        assert np.allclose(np.asarray(got), np.asarray(want), atol=1e-4, rtol=1e-4)

    print("KERNEL_OK")
</pallas_src>

<mosaic_0001>
module attributes {stable_mosaic.version = 11 : i64} {
  func.func @_encoder_kernel(%arg0: i32, %arg1: memref<1x16x16xf32, #tpu.memory_space<vmem>>, %arg2: memref<1x16x128xf32, #tpu.memory_space<vmem>>, %arg3: memref<5x128x128xf32, #tpu.memory_space<vmem>>, %arg4: memref<5x1x128xf32, #tpu.memory_space<vmem>>, %arg5: memref<5x128x128xf32, #tpu.memory_space<vmem>>, %arg6: memref<5x1x128xf32, #tpu.memory_space<vmem>>, %arg7: memref<5x1x128xf32, #tpu.memory_space<vmem>>, %arg8: memref<5x1x128xf32, #tpu.memory_space<vmem>>, %arg9: memref<1x5x16x128xf32, #tpu.memory_space<vmem>>) attributes {dimension_semantics = [#tpu.dimension_semantics<parallel>], iteration_bounds = array<i64: 8>, scalar_prefetch = 0 : i64, scratch_operands = 0 : i64, tpu.core_type = #tpu.core_type<tc>, window_params = [{transform_indices = @transform_0, window_bounds = array<i64: 1, 16, 16>}, {transform_indices = @transform_1, window_bounds = array<i64: 1, 16, 128>}, {pipeline_mode = #tpu.pipeline_mode<synchronous>, transform_indices = @transform_2, window_bounds = array<i64: 5, 128, 128>}, {pipeline_mode = #tpu.pipeline_mode<synchronous>, transform_indices = @transform_3, window_bounds = array<i64: 5, 1, 128>}, {pipeline_mode = #tpu.pipeline_mode<synchronous>, transform_indices = @transform_4, window_bounds = array<i64: 5, 128, 128>}, {pipeline_mode = #tpu.pipeline_mode<synchronous>, transform_indices = @transform_5, window_bounds = array<i64: 5, 1, 128>}, {pipeline_mode = #tpu.pipeline_mode<synchronous>, transform_indices = @transform_6, window_bounds = array<i64: 5, 1, 128>}, {pipeline_mode = #tpu.pipeline_mode<synchronous>, transform_indices = @transform_7, window_bounds = array<i64: 5, 1, 128>}, {transform_indices = @transform_8, window_bounds = array<i64: 1, 5, 16, 128>}]} {
    %c0 = arith.constant 0 : index
    %c0_0 = arith.constant 0 : index
    %c0_1 = arith.constant 0 : index
    %0 = vector.load %arg1[%c0, %c0_0, %c0_1] : memref<1x16x16xf32, #tpu.memory_space<vmem>>, vector<1x16x16xf32>
    %1 = vector.shape_cast %0 : vector<1x16x16xf32> to vector<16x16xf32>
    %c0_2 = arith.constant 0 : index
    %c0_3 = arith.constant 0 : index
    %c0_4 = arith.constant 0 : index
    %2 = vector.load %arg2[%c0_2, %c0_3, %c0_4] : memref<1x16x128xf32, #tpu.memory_space<vmem>>, vector<1x16x128xf32>
    %3 = vector.shape_cast %2 : vector<1x16x128xf32> to vector<16x128xf32>
    %cst = arith.constant dense<0.000000e+00> : vector<16x128xf32>
    %4 = tpu.matmul %1, %3, %cst {dimension_numbers = #tpu.dot_dimension_numbers<[1], [0], [0], [1], [0, 0, 1, 1], [], []>} : vector<16x16xf32>, vector<16x128xf32>, vector<16x128xf32> -> vector<16x128xf32>
    %c0_5 = arith.constant 0 : index
    %c0_6 = arith.constant 0 : index
    %c0_7 = arith.constant 0 : index
    %5 = vector.load %arg3[%c0_5, %c0_6, %c0_7] : memref<5x128x128xf32, #tpu.memory_space<vmem>>, vector<1x128x128xf32>
    %6 = vector.shape_cast %5 : vector<1x128x128xf32> to vector<128x128xf32>
    %cst_8 = arith.constant dense<0.000000e+00> : vector<16x128xf32>
    %7 = tpu.matmul %4, %6, %cst_8 {dimension_numbers = #tpu.dot_dimension_numbers<[1], [0], [0], [1], [0, 0, 1, 1], [], []>} : vector<16x128xf32>, vector<128x128xf32>, vector<16x128xf32> -> vector<16x128xf32>
    %c0_9 = arith.constant 0 : index
    %c0_10 = arith.constant 0 : index
    %c0_11 = arith.constant 0 : index
    %8 = vector.load %arg4[%c0_9, %c0_10, %c0_11] : memref<5x1x128xf32, #tpu.memory_space<vmem>>, vector<1x1x128xf32>
    %9 = vector.shape_cast %8 : vector<1x1x128xf32> to vector<1x128xf32>
    %10 = vector.broadcast %9 : vector<1x128xf32> to vector<16x128xf32>
    %11 = arith.addf %7, %10 : vector<16x128xf32>
    %cst_12 = arith.constant 0.000000e+00 : f32
    %12 = vector.broadcast %cst_12 : f32 to vector<16x128xf32>
    %13 = arith.maximumf %11, %12 : vector<16x128xf32>
    %c0_13 = arith.constant 0 : index
    %c0_14 = arith.constant 0 : index
    %c0_15 = arith.constant 0 : index
    %14 = vector.load %arg5[%c0_13, %c0_14, %c0_15] : memref<5x128x128xf32, #tpu.memory_space<vmem>>, vector<1x128x128xf32>
    %15 = vector.shape_cast %14 : vector<1x128x128xf32> to vector<128x128xf32>
    %cst_16 = arith.constant dense<0.000000e+00> : vector<16x128xf32>
    %16 = tpu.matmul %13, %15, %cst_16 {dimension_numbers = #tpu.dot_dimension_numbers<[1], [0], [0], [1], [0, 0, 1, 1], [], []>} : vector<16x128xf32>, vector<128x128xf32>, vector<16x128xf32> -> vector<16x128xf32>
    %c0_17 = arith.constant 0 : index
    %c0_18 = arith.constant 0 : index
    %c0_19 = arith.constant 0 : index
    %17 = vector.load %arg6[%c0_17, %c0_18, %c0_19] : memref<5x1x128xf32, #tpu.memory_space<vmem>>, vector<1x1x128xf32>
    %18 = vector.shape_cast %17 : vector<1x1x128xf32> to vector<1x128xf32>
    %19 = vector.broadcast %18 : vector<1x128xf32> to vector<16x128xf32>
    %20 = arith.addf %16, %19 : vector<16x128xf32>
    %cst_20 = arith.constant 0.000000e+00 : f32
    %21 = vector.broadcast %cst_20 : f32 to vector<16x128xf32>
    %22 = arith.maximumf %20, %21 : vector<16x128xf32>
    %cst_21 = arith.constant dense<0.000000e+00> : vector<128xf32>
    %23 = vector.multi_reduction <add>, %22, %cst_21 [0] : vector<16x128xf32> to vector<128xf32>
    %24 = vector.shape_cast %23 : vector<128xf32> to vector<1x128xf32>
    %25 = arith.mulf %22, %22 : vector<16x128xf32>
    %cst_22 = arith.constant dense<0.000000e+00> : vector<128xf32>
    %26 = vector.multi_reduction <add>, %25, %cst_22 [0] : vector<16x128xf32> to vector<128xf32>
    %27 = vector.shape_cast %26 : vector<128xf32> to vector<1x128xf32>
    %cst_23 = arith.constant 6.250000e-02 : f32
    %28 = vector.broadcast %cst_23 : f32 to vector<1x128xf32>
    %29 = arith.mulf %24, %28 : vector<1x128xf32>
    %cst_24 = arith.constant 6.250000e-02 : f32
    %30 = vector.broadcast %cst_24 : f32 to vector<1x128xf32>
    %31 = arith.mulf %27, %30 : vector<1x128xf32>
    %32 = arith.mulf %29, %29 : vector<1x128xf32>
    %33 = arith.subf %31, %32 : vector<1x128xf32>
    %cst_25 = arith.constant 9.99999974E-6 : f32
    %34 = vector.broadcast %cst_25 : f32 to vector<1x128xf32>
    %35 = arith.addf %33, %34 : vector<1x128xf32>
    %36 = math.rsqrt %35 : vector<1x128xf32>
    %c0_26 = arith.constant 0 : index
    %c0_27 = arith.constant 0 : index
    %c0_28 = arith.constant 0 : index
    %37 = vector.load %arg7[%c0_26, %c0_27, %c0_28] : memref<5x1x128xf32, #tpu.memory_space<vmem>>, vector<1x1x128xf32>
    %38 = vector.shape_cast %37 : vector<1x1x128xf32> to vector<1x128xf32>
    %39 = arith.mulf %36, %38 : vector<1x128xf32>
    %c0_29 = arith.constant 0 : index
    %c0_30 = arith.constant 0 : index
    %c0_31 = arith.constant 0 : index
    %40 = vector.load %arg8[%c0_29, %c0_30, %c0_31] : memref<5x1x128xf32, #tpu.memory_space<vmem>>, vector<1x1x128xf32>
    %41 = vector.shape_cast %40 : vector<1x1x128xf32> to vector<1x128xf32>
    %42 = arith.mulf %29, %39 : vector<1x128xf32>
    %43 = arith.subf %41, %42 : vector<1x128xf32>
    %44 = vector.broadcast %39 : vector<1x128xf32> to vector<16x128xf32>
    %45 = arith.mulf %22, %44 : vector<16x128xf32>
    %46 = vector.broadcast %43 : vector<1x128xf32> to vector<16x128xf32>
    %47 = arith.addf %45, %46 : vector<16x128xf32>
    %c0_32 = arith.constant 0 : index
    %c0_33 = arith.constant 0 : index
    %c0_34 = arith.constant 0 : index
    %c0_35 = arith.constant 0 : index
    %48 = vector.load %arg9[%c0_32, %c0_33, %c0_34, %c0_35] : memref<1x5x16x128xf32, #tpu.memory_space<vmem>>, vector<1x1x16x128xf32>
    %49 = vector.shape_cast %48 : vector<1x1x16x128xf32> to vector<16x128xf32>
    %50 = vector.shape_cast %47 : vector<16x128xf32> to vector<1x1x16x128xf32>
    tpu.vector_store %arg9[%c0_32, %c0_33, %c0_34, %c0_35], %50 {strides = array<i32>} : memref<1x5x16x128xf32, #tpu.memory_space<vmem>>, vector<1x1x16x128xf32>,
    %cst_36 = arith.constant dense<0.000000e+00> : vector<16x128xf32>
    %51 = tpu.matmul %1, %47, %cst_36 {dimension_numbers = #tpu.dot_dimension_numbers<[1], [0], [0], [1], [0, 0, 1, 1], [], []>} : vector<16x16xf32>, vector<16x128xf32>, vector<16x128xf32> -> vector<16x128xf32>
    %c1 = arith.constant 1 : index
    %c0_37 = arith.constant 0 : index
    %c0_38 = arith.constant 0 : index
    %52 = vector.load %arg3[%c1, %c0_37, %c0_38] : memref<5x128x128xf32, #tpu.memory_space<vmem>>, vector<1x128x128xf32>
    %53 = vector.shape_cast %52 : vector<1x128x128xf32> to vector<128x128xf32>
    %cst_39 = arith.constant dense<0.000000e+00> : vector<16x128xf32>
    %54 = tpu.matmul %51, %53, %cst_39 {dimension_numbers = #tpu.dot_dimension_numbers<[1], [0], [0], [1], [0, 0, 1, 1], [], []>} : vector<16x128xf32>, vector<128x128xf32>, vector<16x128xf32> -> vector<16x128xf32>
    %c1_40 = arith.constant 1 : index
    %c0_41 = arith.constant 0 : index
    %c0_42 = arith.constant 0 : index
    %55 = vector.load %arg4[%c1_40, %c0_41, %c0_42] : memref<5x1x128xf32, #tpu.memory_space<vmem>>, vector<1x1x128xf32>
    %56 = vector.shape_cast %55 : vector<1x1x128xf32> to vector<1x128xf32>
    %57 = vector.broadcast %56 : vector<1x128xf32> to vector<16x128xf32>
    %58 = arith.addf %54, %57 : vector<16x128xf32>
    %cst_43 = arith.constant 0.000000e+00 : f32
    %59 = vector.broadcast %cst_43 : f32 to vector<16x128xf32>
    %60 = arith.maximumf %58, %59 : vector<16x128xf32>
    %c1_44 = arith.constant 1 : index
    %c0_45 = arith.constant 0 : index
    %c0_46 = arith.constant 0 : index
    %61 = vector.load %arg5[%c1_44, %c0_45, %c0_46] : memref<5x128x128xf32, #tpu.memory_space<vmem>>, vector<1x128x128xf32>
    %62 = vector.shape_cast %61 : vector<1x128x128xf32> to vector<128x128xf32>
    %cst_47 = arith.constant dense<0.000000e+00> : vector<16x128xf32>
    %63 = tpu.matmul %60, %62, %cst_47 {dimension_numbers = #tpu.dot_dimension_numbers<[1], [0], [0], [1], [0, 0, 1, 1], [], []>} : vector<16x128xf32>, vector<128x128xf32>, vector<16x128xf32> -> vector<16x128xf32>
    %c1_48 = arith.constant 1 : index
    %c0_49 = arith.constant 0 : index
    %c0_50 = arith.constant 0 : index
    %64 = vector.load %arg6[%c1_48, %c0_49, %c0_50] : memref<5x1x128xf32, #tpu.memory_space<vmem>>, vector<1x1x128xf32>
    %65 = vector.shape_cast %64 : vector<1x1x128xf32> to vector<1x128xf32>
    %66 = vector.broadcast %65 : vector<1x128xf32> to vector<16x128xf32>
    %67 = arith.addf %63, %66 : vector<16x128xf32>
    %cst_51 = arith.constant 0.000000e+00 : f32
    %68 = vector.broadcast %cst_51 : f32 to vector<16x128xf32>
    %69 = arith.maximumf %67, %68 : vector<16x128xf32>
    %cst_52 = arith.constant dense<0.000000e+00> : vector<128xf32>
    %70 = vector.multi_reduction <add>, %69, %cst_52 [0] : vector<16x128xf32> to vector<128xf32>
    %71 = vector.shape_cast %70 : vector<128xf32> to vector<1x128xf32>
    %72 = arith.mulf %69, %69 : vector<16x128xf32>
    %cst_53 = arith.constant dense<0.000000e+00> : vector<128xf32>
    %73 = vector.multi_reduction <add>, %72, %cst_53 [0] : vector<16x128xf32> to vector<128xf32>
    %74 = vector.shape_cast %73 : vector<128xf32> to vector<1x128xf32>
    %cst_54 = arith.constant 6.250000e-02 : f32
    %75 = vector.broadcast %cst_54 : f32 to vector<1x128xf32>
    %76 = arith.mulf %71, %75 : vector<1x128xf32>
    %cst_55 = arith.constant 6.250000e-02 : f32
    %77 = vector.broadcast %cst_55 : f32 to vector<1x128xf32>
    %78 = arith.mulf %74, %77 : vector<1x128xf32>
    %79 = arith.mulf %76, %76 : vector<1x128xf32>
    %80 = arith.subf %78, %79 : vector<1x128xf32>
    %cst_56 = arith.constant 9.99999974E-6 : f32
    %81 = vector.broadcast %cst_56 : f32 to vector<1x128xf32>
    %82 = arith.addf %80, %81 : vector<1x128xf32>
    %83 = math.rsqrt %82 : vector<1x128xf32>
    %c1_57 = arith.constant 1 : index
    %c0_58 = arith.constant 0 : index
    %c0_59 = arith.constant 0 : index
    %84 = vector.load %arg7[%c1_57, %c0_58, %c0_59] : memref<5x1x128xf32, #tpu.memory_space<vmem>>, vector<1x1x128xf32>
    %85 = vector.shape_cast %84 : vector<1x1x128xf32> to vector<1x128xf32>
    %86 = arith.mulf %83, %85 : vector<1x128xf32>
    %c1_60 = arith.constant 1 : index
    %c0_61 = arith.constant 0 : index
    %c0_62 = arith.constant 0 : index
    %87 = vector.load %arg8[%c1_60, %c0_61, %c0_62] : memref<5x1x128xf32, #tpu.memory_space<vmem>>, vector<1x1x128xf32>
    %88 = vector.shape_cast %87 : vector<1x1x128xf32> to vector<1x128xf32>
    %89 = arith.mulf %76, %86 : vector<1x128xf32>
    %90 = arith.subf %88, %89 : vector<1x128xf32>
    %91 = vector.broadcast %86 : vector<1x128xf32> to vector<16x128xf32>
    %92 = arith.mulf %69, %91 : vector<16x128xf32>
    %93 = vector.broadcast %90 : vector<1x128xf32> to vector<16x128xf32>
    %94 = arith.addf %92, %93 : vector<16x128xf32>
    %c0_63 = arith.constant 0 : index
    %c1_64 = arith.constant 1 : index
    %c0_65 = arith.constant 0 : index
    %c0_66 = arith.constant 0 : index
    %95 = vector.load %arg9[%c0_63, %c1_64, %c0_65, %c0_66] : memref<1x5x16x128xf32, #tpu.memory_space<vmem>>, vector<1x1x16x128xf32>
    %96 = vector.shape_cast %95 : vector<1x1x16x128xf32> to vector<16x128xf32>
    %97 = vector.shape_cast %94 : vector<16x128xf32> to vector<1x1x16x128xf32>
    tpu.vector_store %arg9[%c0_63, %c1_64, %c0_65, %c0_66], %97 {strides = array<i32>} : memref<1x5x16x128xf32, #tpu.memory_space<vmem>>, vector<1x1x16x128xf32>,
    %cst_67 = arith.constant dense<0.000000e+00> : vector<16x128xf32>
    %98 = tpu.matmul %1, %94, %cst_67 {dimension_numbers = #tpu.dot_dimension_numbers<[1], [0], [0], [1], [0, 0, 1, 1], [], []>} : vector<16x16xf32>, vector<16x128xf32>, vector<16x128xf32> -> vector<16x128xf32>
    %c2 = arith.constant 2 : index
    %c0_68 = arith.constant 0 : index
    %c0_69 = arith.constant 0 : index
    %99 = vector.load %arg3[%c2, %c0_68, %c0_69] : memref<5x128x128xf32, #tpu.memory_space<vmem>>, vector<1x128x128xf32>
    %100 = vector.shape_cast %99 : vector<1x128x128xf32> to vector<128x128xf32>
    %cst_70 = arith.constant dense<0.000000e+00> : vector<16x128xf32>
    %101 = tpu.matmul %98, %100, %cst_70 {dimension_numbers = #tpu.dot_dimension_numbers<[1], [0], [0], [1], [0, 0, 1, 1], [], []>} : vector<16x128xf32>, vector<128x128xf32>, vector<16x128xf32> -> vector<16x128xf32>
    %c2_71 = arith.constant 2 : index
    %c0_72 = arith.constant 0 : index
    %c0_73 = arith.constant 0 : index
    %102 = vector.load %arg4[%c2_71, %c0_72, %c0_73] : memref<5x1x128xf32, #tpu.memory_space<vmem>>, vector<1x1x128xf32>
    %103 = vector.shape_cast %102 : vector<1x1x128xf32> to vector<1x128xf32>
    %104 = vector.broadcast %103 : vector<1x128xf32> to vector<16x128xf32>
    %105 = arith.addf %101, %104 : vector<16x128xf32>
    %cst_74 = arith.constant 0.000000e+00 : f32
    %106 = vector.broadcast %cst_74 : f32 to vector<16x128xf32>
    %107 = arith.maximumf %105, %106 : vector<16x128xf32>
    %c2_75 = arith.constant 2 : index
    %c0_76 = arith.constant 0 : index
    %c0_77 = arith.constant 0 : index
    %108 = vector.load %arg5[%c2_75, %c0_76, %c0_77] : memref<5x128x128xf32, #tpu.memory_space<vmem>>, vector<1x128x128xf32>
    %109 = vector.shape_cast %108 : vector<1x128x128xf32> to vector<128x128xf32>
    %cst_78 = arith.constant dense<0.000000e+00> : vector<16x128xf32>
    %110 = tpu.matmul %107, %109, %cst_78 {dimension_numbers = #tpu.dot_dimension_numbers<[1], [0], [0], [1], [0, 0, 1, 1], [], []>} : vector<16x128xf32>, vector<128x128xf32>, vector<16x128xf32> -> vector<16x128xf32>
    %c2_79 = arith.constant 2 : index
    %c0_80 = arith.constant 0 : index
    %c0_81 = arith.constant 0 : index
    %111 = vector.load %arg6[%c2_79, %c0_80, %c0_81] : memref<5x1x128xf32, #tpu.memory_space<vmem>>, vector<1x1x128xf32>
    %112 = vector.shape_cast %111 : vector<1x1x128xf32> to vector<1x128xf32>
    %113 = vector.broadcast %112 : vector<1x128xf32> to vector<16x128xf32>
    %114 = arith.addf %110, %113 : vector<16x128xf32>
    %cst_82 = arith.constant 0.000000e+00 : f32
    %115 = vector.broadcast %cst_82 : f32 to vector<16x128xf32>
    %116 = arith.maximumf %114, %115 : vector<16x128xf32>
    %cst_83 = arith.constant dense<0.000000e+00> : vector<128xf32>
    %117 = vector.multi_reduction <add>, %116, %cst_83 [0] : vector<16x128xf32> to vector<128xf32>
    %118 = vector.shape_cast %117 : vector<128xf32> to vector<1x128xf32>
    %119 = arith.mulf %116, %116 : vector<16x128xf32>
    %cst_84 = arith.constant dense<0.000000e+00> : vector<128xf32>
    %120 = vector.multi_reduction <add>, %119, %cst_84 [0] : vector<16x128xf32> to vector<128xf32>
    %121 = vector.shape_cast %120 : vector<128xf32> to vector<1x128xf32>
    %cst_85 = arith.constant 6.250000e-02 : f32
    %122 = vector.broadcast %cst_85 : f32 to vector<1x128xf32>
    %123 = arith.mulf %118, %122 : vector<1x128xf32>
    %cst_86 = arith.constant 6.250000e-02 : f32
    %124 = vector.broadcast %cst_86 : f32 to vector<1x128xf32>
    %125 = arith.mulf %121, %124 : vector<1x128xf32>
    %126 = arith.mulf %123, %123 : vector<1x128xf32>
    %127 = arith.subf %125, %126 : vector<1x128xf32>
    %cst_87 = arith.constant 9.99999974E-6 : f32
    %128 = vector.broadcast %cst_87 : f32 to vector<1x128xf32>
    %129 = arith.addf %127, %128 : vector<1x128xf32>
    %130 = math.rsqrt %129 : vector<1x128xf32>
    %c2_88 = arith.constant 2 : index
    %c0_89 = arith.constant 0 : index
    %c0_90 = arith.constant 0 : index
    %131 = vector.load %arg7[%c2_88, %c0_89, %c0_90] : memref<5x1x128xf32, #tpu.memory_space<vmem>>, vector<1x1x128xf32>
    %132 = vector.shape_cast %131 : vector<1x1x128xf32> to vector<1x128xf32>
    %133 = arith.mulf %130, %132 : vector<1x128xf32>
    %c2_91 = arith.constant 2 : index
    %c0_92 = arith.constant 0 : index
    %c0_93 = arith.constant 0 : index
    %134 = vector.load %arg8[%c2_91, %c0_92, %c0_93] : memref<5x1x128xf32, #tpu.memory_space<vmem>>, vector<1x1x128xf32>
    %135 = vector.shape_cast %134 : vector<1x1x128xf32> to vector<1x128xf32>
    %136 = arith.mulf %123, %133 : vector<1x128xf32>
    %137 = arith.subf %135, %136 : vector<1x128xf32>
    %138 = vector.broadcast %133 : vector<1x128xf32> to vector<16x128xf32>
    %139 = arith.mulf %116, %138 : vector<16x128xf32>
    %140 = vector.broadcast %137 : vector<1x128xf32> to vector<16x128xf32>
    %141 = arith.addf %139, %140 : vector<16x128xf32>
    %c0_94 = arith.constant 0 : index
    %c2_95 = arith.constant 2 : index
    %c0_96 = arith.constant 0 : index
    %c0_97 = arith.constant 0 : index
    %142 = vector.load %arg9[%c0_94, %c2_95, %c0_96, %c0_97] : memref<1x5x16x128xf32, #tpu.memory_space<vmem>>, vector<1x1x16x128xf32>
    %143 = vector.shape_cast %142 : vector<1x1x16x128xf32> to vector<16x128xf32>
    %144 = vector.shape_cast %141 : vector<16x128xf32> to vector<1x1x16x128xf32>
    tpu.vector_store %arg9[%c0_94, %c2_95, %c0_96, %c0_97], %144 {strides = array<i32>} : memref<1x5x16x128xf32, #tpu.memory_space<vmem>>, vector<1x1x16x128xf32>,
    %cst_98 = arith.constant dense<0.000000e+00> : vector<16x128xf32>
    %145 = tpu.matmul %1, %141, %cst_98 {dimension_numbers = #tpu.dot_dimension_numbers<[1], [0], [0], [1], [0, 0, 1, 1], [], []>} : vector<16x16xf32>, vector<16x128xf32>, vector<16x128xf32> -> vector<16x128xf32>
    %c3 = arith.constant 3 : index
    %c0_99 = arith.constant 0 : index
    %c0_100 = arith.constant 0 : index
    %146 = vector.load %arg3[%c3, %c0_99, %c0_100] : memref<5x128x128xf32, #tpu.memory_space<vmem>>, vector<1x128x128xf32>
    %147 = vector.shape_cast %146 : vector<1x128x128xf32> to vector<128x128xf32>
    %cst_101 = arith.constant dense<0.000000e+00> : vector<16x128xf32>
    %148 = tpu.matmul %145, %147, %cst_101 {dimension_numbers = #tpu.dot_dimension_numbers<[1], [0], [0], [1], [0, 0, 1, 1], [], []>} : vector<16x128xf32>, vector<128x128xf32>, vector<16x128xf32> -> vector<16x128xf32>
    %c3_102 = arith.constant 3 : index
    %c0_103 = arith.constant 0 : index
    %c0_104 = arith.constant 0 : index
    %149 = vector.load %arg4[%c3_102, %c0_103, %c0_104] : memref<5x1x128xf32, #tpu.memory_space<vmem>>, vector<1x1x128xf32>
    %150 = vector.shape_cast %149 : vector<1x1x128xf32> to vector<1x128xf32>
    %151 = vector.broadcast %150 : vector<1x128xf32> to vector<16x128xf32>
    %152 = arith.addf %148, %151 : vector<16x128xf32>
    %cst_105 = arith.constant 0.000000e+00 : f32
    %153 = vector.broadcast %cst_105 : f32 to vector<16x128xf32>
    %154 = arith.maximumf %152, %153 : vector<16x128xf32>
    %c3_106 = arith.constant 3 : index
    %c0_107 = arith.constant 0 : index
    %c0_108 = arith.constant 0 : index
    %155 = vector.load %arg5[%c3_106, %c0_107, %c0_108] : memref<5x128x128xf32, #tpu.memory_space<vmem>>, vector<1x128x128xf32>
    %156 = vector.shape_cast %155 : vector<1x128x128xf32> to vector<128x128xf32>
    %cst_109 = arith.constant dense<0.000000e+00> : vector<16x128xf32>
    %157 = tpu.matmul %154, %156, %cst_109 {dimension_numbers = #tpu.dot_dimension_numbers<[1], [0], [0], [1], [0, 0, 1, 1], [], []>} : vector<16x128xf32>, vector<128x128xf32>, vector<16x128xf32> -> vector<16x128xf32>
    %c3_110 = arith.constant 3 : index
    %c0_111 = arith.constant 0 : index
    %c0_112 = arith.constant 0 : index
    %158 = vector.load %arg6[%c3_110, %c0_111, %c0_112] : memref<5x1x128xf32, #tpu.memory_space<vmem>>, vector<1x1x128xf32>
    %159 = vector.shape_cast %158 : vector<1x1x128xf32> to vector<1x128xf32>
    %160 = vector.broadcast %159 : vector<1x128xf32> to vector<16x128xf32>
    %161 = arith.addf %157, %160 : vector<16x128xf32>
    %cst_113 = arith.constant 0.000000e+00 : f32
    %162 = vector.broadcast %cst_113 : f32 to vector<16x128xf32>
    %163 = arith.maximumf %161, %162 : vector<16x128xf32>
    %cst_114 = arith.constant dense<0.000000e+00> : vector<128xf32>
    %164 = vector.multi_reduction <add>, %163, %cst_114 [0] : vector<16x128xf32> to vector<128xf32>
    %165 = vector.shape_cast %164 : vector<128xf32> to vector<1x128xf32>
    %166 = arith.mulf %163, %163 : vector<16x128xf32>
    %cst_115 = arith.constant dense<0.000000e+00> : vector<128xf32>
    %167 = vector.multi_reduction <add>, %166, %cst_115 [0] : vector<16x128xf32> to vector<128xf32>
    %168 = vector.shape_cast %167 : vector<128xf32> to vector<1x128xf32>
    %cst_116 = arith.constant 6.250000e-02 : f32
    %169 = vector.broadcast %cst_116 : f32 to vector<1x128xf32>
    %170 = arith.mulf %165, %169 : vector<1x128xf32>
    %cst_117 = arith.constant 6.250000e-02 : f32
    %171 = vector.broadcast %cst_117 : f32 to vector<1x128xf32>
    %172 = arith.mulf %168, %171 : vector<1x128xf32>
    %173 = arith.mulf %170, %170 : vector<1x128xf32>
    %174 = arith.subf %172, %173 : vector<1x128xf32>
    %cst_118 = arith.constant 9.99999974E-6 : f32
    %175 = vector.broadcast %cst_118 : f32 to vector<1x128xf32>
    %176 = arith.addf %174, %175 : vector<1x128xf32>
    %177 = math.rsqrt %176 : vector<1x128xf32>
    %c3_119 = arith.constant 3 : index
    %c0_120 = arith.constant 0 : index
    %c0_121 = arith.constant 0 : index
    %178 = vector.load %arg7[%c3_119, %c0_120, %c0_121] : memref<5x1x128xf32, #tpu.memory_space<vmem>>, vector<1x1x128xf32>
    %179 = vector.shape_cast %178 : vector<1x1x128xf32> to vector<1x128xf32>
    %180 = arith.mulf %177, %179 : vector<1x128xf32>
    %c3_122 = arith.constant 3 : index
    %c0_123 = arith.constant 0 : index
    %c0_124 = arith.constant 0 : index
    %181 = vector.load %arg8[%c3_122, %c0_123, %c0_124] : memref<5x1x128xf32, #tpu.memory_space<vmem>>, vector<1x1x128xf32>
    %182 = vector.shape_cast %181 : vector<1x1x128xf32> to vector<1x128xf32>
    %183 = arith.mulf %170, %180 : vector<1x128xf32>
    %184 = arith.subf %182, %183 : vector<1x128xf32>
    %185 = vector.broadcast %180 : vector<1x128xf32> to vector<16x128xf32>
    %186 = arith.mulf %163, %185 : vector<16x128xf32>
    %187 = vector.broadcast %184 : vector<1x128xf32> to vector<16x128xf32>
    %188 = arith.addf %186, %187 : vector<16x128xf32>
    %c0_125 = arith.constant 0 : index
    %c3_126 = arith.constant 3 : index
    %c0_127 = arith.constant 0 : index
    %c0_128 = arith.constant 0 : index
    %189 = vector.load %arg9[%c0_125, %c3_126, %c0_127, %c0_128] : memref<1x5x16x128xf32, #tpu.memory_space<vmem>>, vector<1x1x16x128xf32>
    %190 = vector.shape_cast %189 : vector<1x1x16x128xf32> to vector<16x128xf32>
    %191 = vector.shape_cast %188 : vector<16x128xf32> to vector<1x1x16x128xf32>
    tpu.vector_store %arg9[%c0_125, %c3_126, %c0_127, %c0_128], %191 {strides = array<i32>} : memref<1x5x16x128xf32, #tpu.memory_space<vmem>>, vector<1x1x16x128xf32>,
    %cst_129 = arith.constant dense<0.000000e+00> : vector<16x128xf32>
    %192 = tpu.matmul %1, %188, %cst_129 {dimension_numbers = #tpu.dot_dimension_numbers<[1], [0], [0], [1], [0, 0, 1, 1], [], []>} : vector<16x16xf32>, vector<16x128xf32>, vector<16x128xf32> -> vector<16x128xf32>
    %c4 = arith.constant 4 : index
    %c0_130 = arith.constant 0 : index
    %c0_131 = arith.constant 0 : index
    %193 = vector.load %arg3[%c4, %c0_130, %c0_131] : memref<5x128x128xf32, #tpu.memory_space<vmem>>, vector<1x128x128xf32>
    %194 = vector.shape_cast %193 : vector<1x128x128xf32> to vector<128x128xf32>
    %cst_132 = arith.constant dense<0.000000e+00> : vector<16x128xf32>
    %195 = tpu.matmul %192, %194, %cst_132 {dimension_numbers = #tpu.dot_dimension_numbers<[1], [0], [0], [1], [0, 0, 1, 1], [], []>} : vector<16x128xf32>, vector<128x128xf32>, vector<16x128xf32> -> vector<16x128xf32>
    %c4_133 = arith.constant 4 : index
    %c0_134 = arith.constant 0 : index
    %c0_135 = arith.constant 0 : index
    %196 = vector.load %arg4[%c4_133, %c0_134, %c0_135] : memref<5x1x128xf32, #tpu.memory_space<vmem>>, vector<1x1x128xf32>
    %197 = vector.shape_cast %196 : vector<1x1x128xf32> to vector<1x128xf32>
    %198 = vector.broadcast %197 : vector<1x128xf32> to vector<16x128xf32>
    %199 = arith.addf %195, %198 : vector<16x128xf32>
    %cst_136 = arith.constant 0.000000e+00 : f32
    %200 = vector.broadcast %cst_136 : f32 to vector<16x128xf32>
    %201 = arith.maximumf %199, %200 : vector<16x128xf32>
    %c4_137 = arith.constant 4 : index
    %c0_138 = arith.constant 0 : index
    %c0_139 = arith.constant 0 : index
    %202 = vector.load %arg5[%c4_137, %c0_138, %c0_139] : memref<5x128x128xf32, #tpu.memory_space<vmem>>, vector<1x128x128xf32>
    %203 = vector.shape_cast %202 : vector<1x128x128xf32> to vector<128x128xf32>
    %cst_140 = arith.constant dense<0.000000e+00> : vector<16x128xf32>
    %204 = tpu.matmul %201, %203, %cst_140 {dimension_numbers = #tpu.dot_dimension_numbers<[1], [0], [0], [1], [0, 0, 1, 1], [], []>} : vector<16x128xf32>, vector<128x128xf32>, vector<16x128xf32> -> vector<16x128xf32>
    %c4_141 = arith.constant 4 : index
    %c0_142 = arith.constant 0 : index
    %c0_143 = arith.constant 0 : index
    %205 = vector.load %arg6[%c4_141, %c0_142, %c0_143] : memref<5x1x128xf32, #tpu.memory_space<vmem>>, vector<1x1x128xf32>
    %206 = vector.shape_cast %205 : vector<1x1x128xf32> to vector<1x128xf32>
    %207 = vector.broadcast %206 : vector<1x128xf32> to vector<16x128xf32>
    %208 = arith.addf %204, %207 : vector<16x128xf32>
    %cst_144 = arith.constant 0.000000e+00 : f32
    %209 = vector.broadcast %cst_144 : f32 to vector<16x128xf32>
    %210 = arith.maximumf %208, %209 : vector<16x128xf32>
    %cst_145 = arith.constant dense<0.000000e+00> : vector<128xf32>
    %211 = vector.multi_reduction <add>, %210, %cst_145 [0] : vector<16x128xf32> to vector<128xf32>
    %212 = vector.shape_cast %211 : vector<128xf32> to vector<1x128xf32>
    %213 = arith.mulf %210, %210 : vector<16x128xf32>
    %cst_146 = arith.constant dense<0.000000e+00> : vector<128xf32>
    %214 = vector.multi_reduction <add>, %213, %cst_146 [0] : vector<16x128xf32> to vector<128xf32>
    %215 = vector.shape_cast %214 : vector<128xf32> to vector<1x128xf32>
    %cst_147 = arith.constant 6.250000e-02 : f32
    %216 = vector.broadcast %cst_147 : f32 to vector<1x128xf32>
    %217 = arith.mulf %212, %216 : vector<1x128xf32>
    %cst_148 = arith.constant 6.250000e-02 : f32
    %218 = vector.broadcast %cst_148 : f32 to vector<1x128xf32>
    %219 = arith.mulf %215, %218 : vector<1x128xf32>
    %220 = arith.mulf %217, %217 : vector<1x128xf32>
    %221 = arith.subf %219, %220 : vector<1x128xf32>
    %cst_149 = arith.constant 9.99999974E-6 : f32
    %222 = vector.broadcast %cst_149 : f32 to vector<1x128xf32>
    %223 = arith.addf %221, %222 : vector<1x128xf32>
    %224 = math.rsqrt %223 : vector<1x128xf32>
    %c4_150 = arith.constant 4 : index
    %c0_151 = arith.constant 0 : index
    %c0_152 = arith.constant 0 : index
    %225 = vector.load %arg7[%c4_150, %c0_151, %c0_152] : memref<5x1x128xf32, #tpu.memory_space<vmem>>, vector<1x1x128xf32>
    %226 = vector.shape_cast %225 : vector<1x1x128xf32> to vector<1x128xf32>
    %227 = arith.mulf %224, %226 : vector<1x128xf32>
    %c4_153 = arith.constant 4 : index
    %c0_154 = arith.constant 0 : index
    %c0_155 = arith.constant 0 : index
    %228 = vector.load %arg8[%c4_153, %c0_154, %c0_155] : memref<5x1x128xf32, #tpu.memory_space<vmem>>, vector<1x1x128xf32>
    %229 = vector.shape_cast %228 : vector<1x1x128xf32> to vector<1x128xf32>
    %230 = arith.mulf %217, %227 : vector<1x128xf32>
    %231 = arith.subf %229, %230 : vector<1x128xf32>
    %232 = vector.broadcast %227 : vector<1x128xf32> to vector<16x128xf32>
    %233 = arith.mulf %210, %232 : vector<16x128xf32>
    %234 = vector.broadcast %231 : vector<1x128xf32> to vector<16x128xf32>
    %235 = arith.addf %233, %234 : vector<16x128xf32>
    %c0_156 = arith.constant 0 : index
    %c4_157 = arith.constant 4 : index
    %c0_158 = arith.constant 0 : index
    %c0_159 = arith.constant 0 : index
    %236 = vector.load %arg9[%c0_156, %c4_157, %c0_158, %c0_159] : memref<1x5x16x128xf32, #tpu.memory_space<vmem>>, vector<1x1x16x128xf32>
    %237 = vector.shape_cast %236 : vector<1x1x16x128xf32> to vector<16x128xf32>
    %238 = vector.shape_cast %235 : vector<16x128xf32> to vector<1x1x16x128xf32>
    tpu.vector_store %arg9[%c0_156, %c4_157, %c0_158, %c0_159], %238 {strides = array<i32>} : memref<1x5x16x128xf32, #tpu.memory_space<vmem>>, vector<1x1x16x128xf32>,
    return
  }
  func.func @transform_0(%arg0: i32) -> (i32, i32, i32) {
    %c0_i32 = arith.constant 0 : i32
    %c0_i32_0 = arith.constant 0 : i32
    %c0_i32_1 = arith.constant 0 : i32
    return %arg0, %c0_i32, %c0_i32_0 : i32, i32, i32
  }
  func.func @transform_1(%arg0: i32) -> (i32, i32, i32) {
    %c0_i32 = arith.constant 0 : i32
    %c0_i32_0 = arith.constant 0 : i32
    %c0_i32_1 = arith.constant 0 : i32
    return %arg0, %c0_i32, %c0_i32_0 : i32, i32, i32
  }
  func.func @transform_2(%arg0: i32) -> (i32, i32, i32) {
    %c0_i32 = arith.constant 0 : i32
    %c0_i32_0 = arith.constant 0 : i32
    %c0_i32_1 = arith.constant 0 : i32
    %c0_i32_2 = arith.constant 0 : i32
    return %c0_i32, %c0_i32_0, %c0_i32_1 : i32, i32, i32
  }
  func.func @transform_3(%arg0: i32) -> (i32, i32, i32) {
    %c0_i32 = arith.constant 0 : i32
    %c0_i32_0 = arith.constant 0 : i32
    %c0_i32_1 = arith.constant 0 : i32
    %c0_i32_2 = arith.constant 0 : i32
    return %c0_i32, %c0_i32_0, %c0_i32_1 : i32, i32, i32
  }
  func.func @transform_4(%arg0: i32) -> (i32, i32, i32) {
    %c0_i32 = arith.constant 0 : i32
    %c0_i32_0 = arith.constant 0 : i32
    %c0_i32_1 = arith.constant 0 : i32
    %c0_i32_2 = arith.constant 0 : i32
    return %c0_i32, %c0_i32_0, %c0_i32_1 : i32, i32, i32
  }
  func.func @transform_5(%arg0: i32) -> (i32, i32, i32) {
    %c0_i32 = arith.constant 0 : i32
    %c0_i32_0 = arith.constant 0 : i32
    %c0_i32_1 = arith.constant 0 : i32
    %c0_i32_2 = arith.constant 0 : i32
    return %c0_i32, %c0_i32_0, %c0_i32_1 : i32, i32, i32
  }
  func.func @transform_6(%arg0: i32) -> (i32, i32, i32) {
    %c0_i32 = arith.constant 0 : i32
    %c0_i32_0 = arith.constant 0 : i32
    %c0_i32_1 = arith.constant 0 : i32
    %c0_i32_2 = arith.constant 0 : i32
    return %c0_i32, %c0_i32_0, %c0_i32_1 : i32, i32, i32
  }
  func.func @transform_7(%arg0: i32) -> (i32, i32, i32) {
    %c0_i32 = arith.constant 0 : i32
    %c0_i32_0 = arith.constant 0 : i32
    %c0_i32_1 = arith.constant 0 : i32
    %c0_i32_2 = arith.constant 0 : i32
    return %c0_i32, %c0_i32_0, %c0_i32_1 : i32, i32, i32
  }
  func.func @transform_8(%arg0: i32) -> (i32, i32, i32, i32) {
    %c0_i32 = arith.constant 0 : i32
    %c0_i32_0 = arith.constant 0 : i32
    %c0_i32_1 = arith.constant 0 : i32
    %c0_i32_2 = arith.constant 0 : i32
    return %arg0, %c0_i32, %c0_i32_0, %c0_i32_1 : i32, i32, i32, i32
  }
}

</mosaic_0001>

<bundles_post_ra>
// kernel: tpu_custom_call.1
= control target key start
LH: loop header
LB: loop body
LE: loop exit
PB: predicated region body
PF: predicated region fallthrough
CT: control target
= control target key end

     0   :  { %s3878_s0 = inlined_call_operand.hbm [shape: f32[8,16,16], index: 0, kind: input, shape index: {}]   ;;  %s3879_s1 = inlined_call_operand.hbm [shape: f32[8,16,128], index: 1, kind: input, shape index: {}]   ;;  %s3880_s2 = inlined_call_operand.hbm [shape: f32[5,128,128], index: 2, kind: input, shape index: {}]   ;;  %s3881_s3 = inlined_call_operand.vmem [shape: f32[5,1,128], index: 3, kind: input, shape index: {}]   ;;  %s3882_s4 = inlined_call_operand.hbm [shape: f32[5,128,128], index: 4, kind: input, shape index: {}]   ;;  %s3883_s5 = inlined_call_operand.vmem [shape: f32[5,1,128], index: 5, kind: input, shape index: {}]   ;;  %s3884_s6 = inlined_call_operand.vmem [shape: f32[5,1,128], index: 6, kind: input, shape index: {}]   ;;  %s3885_s7 = inlined_call_operand.vmem [shape: f32[5,1,128], index: 7, kind: input, shape index: {}]   ;;  %s3886_s8 = inlined_call_operand.hbm [shape: f32[8,5,16,128], index: 8, kind: output, shape index: {}]  }
   0x1   :  { %3895 = sst [smem:[#allocation18_spill]] %s3878_s0 }
   0x2   :  { %3896 = sst [smem:[#allocation19_spill]] %s3880_s2 }
   0x3   :  { %3897 = sst [smem:[#allocation20_spill]] %s3882_s4 }
   0x4   :  { %13 = vsyncpa [#allocation3], 0 }
   0x5   :  { %15 = vsyncpa [#allocation3 + $0x1], 0 }
   0x6   :  { %16 = vsyncpa [#allocation6], 0 }
   0x7   :  { %18 = vsyncpa [#allocation6 + $0x1], 0 }
   0x8   :  { %19 = vsyncpa [#allocation9], 0 }
   0x9   :  { %20 = vsyncpa [#allocation4], 0 }
   0xa   :  { %22 = vsyncpa [#allocation4 + $0x1], 0  ;;  %s3481_s27 = smov 0   ;;  %s3483_s28 = smov 0  }
   0xb   :  { %s3485_s29 = smov 0   ;;  %s3487_s30 = smov 0  }
   0xc LB: > { %3898 = sst [smem:[#allocation16_spill]] %s3421_s29  ;;  %s3502_s9 = sadd.s32 4294967295, %s3425_s30   ;;  %s3425_s30 = sphi %s3487_s30, %s3923_s30   ;;  %s3421_s29 = sphi %s3485_s29, %s3920_s29   ;;  %s3417_s28 = sphi %s3483_s28, %s3922_s28   ;;  %s3413_s27 = sphi %s3481_s27, %s3921_s27  }
   0xd   : > { %s2151_s10 = sadd.s32 4294967294, %s3425_s30   ;;  %p48_p0 = scmp.ne.s32.totalorder %s3417_s28, %s3413_s27 }
   0xe   : > { %p3887_p1 = scmp.eq.s32.totalorder %s3502_s9, 0  ;;  %p230_p3 = scmp.eq.s32.totalorder %s2151_s10, 7 }
   0xf   : > { %p2152_p5 = scmp.ge.s32.totalorder %s3425_s30, 1  ;;  %p237_p7 = scmp.lt.s32.totalorder %s3425_s30, 9 }
  0x10   : > { %p3511_p4 = por %p3887_p1, %p48_p0  ;;  %p3516_p6 = por %p230_p3, %p48_p0 }
  0x11   : > { %p3521_p8 = pnand %p2152_p5, %p237_p7  ;;  %s3427_s14 = smov [#allocation7]  }
  0x12   : > { %s3899_s11 = scalar_select %p3511_p4, 1, 0 }
  0x13   : > { %s3900_s12 = scalar_select %p3516_p6, 1, 0 }
  0x14   : > { %s3901_s13 = scalar_select %p3521_p8, 1, 0 }
  0x15   : > { %s249_s15 = sshll.u32 %s3427_s14, 4  ;;  %p3157_p9 = pneg %p3521_p8  ;;  %s250_s15 = int_to_ptr.vmem [resolvable:$true] %s249_s15 }
  0x16   : > { %s3428_s17 = smov [#allocation8]   ;;  %s3903_s2 = sld [smem:[#allocation19_spill]] }
  0x17   : > { %p3529_p10 = pnand %p3157_p9, %p3887_p1  ;;  %s265_s18 = sshll.u32 %s3428_s17, 4  ;;  %s3533_s18 = int_to_ptr.vmem [resolvable:$true] %s265_s18 }
  0x19   : > { %p3233_p12 = pneg %p3529_p10 }
  0x1c   : > { %s3231_s21 = scalar_lea.hbm %s3903_s2, 10240 }
  0x1d   : > { %p3232_p11 = scmp.ne.s32.totalorder %s3903_s2, %s3231_s21  ;;  %p3238_p3 = scmp.lt.u32.totalorder %s3231_s21, %s3903_s2 }
  0x1f   : > { %p3234_p13 = pnand %p3233_p12, %p3232_p11 }
  0x21   : > { %p3235_p0 = pneg %p3234_p13 }
  0x23   : > { %p3240_p5 = pnand %p3238_p3, %p3235_p0 }
  0x25   : > { %3243 = shalt.err (!%p3240_p5)
}
  0x26   : > { %s3244_s26 = scalar_lea.vmem %s250_s15, 10240  ;;  %p3252_p2 = scmp.lt.s32.totalorder %s250_s15, %s250_s15 }
  0x27   : > { %p3245_p7 = scmp.ne.s32.totalorder %s250_s15, %s3244_s26  ;;  %p3253_p6 = scmp.lt.s32.totalorder %s3244_s26, %s3244_s26 }
  0x29   : > { %p3247_p9 = pnand %p3245_p7, %p3233_p12  ;;  %p3254_p4 = por %p3253_p6, %p3252_p2 }
  0x2b   : > { %p3248_p1 = pneg %p3247_p9 }
  0x2d   : > { %p3255_p8 = pnand %p3254_p4, %p3248_p1 }
  0x2f   : > { %3258 = shalt.err (!%p3255_p8)
}
  0x30   : > { %s3890_s10 = smov 128   ;;  %s3892_s14 = smov 8  }
  0x31   : > { %3160 = dma.hbm_to_vmem [thread:$0]  (!%p3529_p10), %s3903_s2, 10240, %s250_s15, [#allocation6], %s3890_s10, %s3890_s10, %s3892_s14  }
  0x32   : > { %s3904_s4 = sld [smem:[#allocation20_spill]] }
  0x38   : > { %s3259_s22 = scalar_lea.hbm %s3904_s4, 10240 }
  0x39   : > { %p3260_p1 = scmp.ne.s32.totalorder %s3904_s4, %s3259_s22  ;;  %p3266_p6 = scmp.lt.u32.totalorder %s3259_s22, %s3904_s4 }
  0x3b   : > { %p3262_p2 = pnand %p3260_p1, %p3233_p12 }
  0x3d   : > { %p3263_p4 = pneg %p3262_p2 }
  0x3f   : > { %p3268_p8 = pnand %p3266_p6, %p3263_p4 }
  0x41   : > { %3271 = shalt.err (!%p3268_p8)
}
  0x42   : > { %s3272_s15 = scalar_lea.vmem %s3533_s18, 10240  ;;  %p3280_p3 = scmp.lt.s32.totalorder %s3533_s18, %s3533_s18 }
  0x43   : > { %p3273_p11 = scmp.ne.s32.totalorder %s3533_s18, %s3272_s15  ;;  %p3281_p5 = scmp.lt.s32.totalorder %s3272_s15, %s3272_s15 }
  0x45   : > { %p3275_p13 = pnand %p3273_p11, %p3233_p12  ;;  %p3282_p7 = por %p3281_p5, %p3280_p3 }
  0x47   : > { %p3276_p0 = pneg %p3275_p13 }
  0x49   : > { %p3283_p9 = pnand %p3282_p7, %p3276_p0 }
  0x4b   : > { %3286 = shalt.err (!%p3283_p9)
}
  0x4c   : > { %3163 = dma.hbm_to_vmem [thread:$0]  (!%p3529_p10), %s3904_s4, 10240, %s3533_s18, [#allocation9], %s3890_s10, %s3890_s10, %s3892_s14  }
  0x4d   : > { %s3589_s16 = sadd.s32 1, %s3425_s30   ;;  %s35_s20 = sadd.s32 1, %s3421_s29 }
  0x4e   : > { %s32_s21 = ssub.s32 %s3425_s30, %s3589_s16  ;;  %p42_p12 = scmp.ne.s32.totalorder %s3421_s29, %s3417_s28 }
  0x4f   : > { %p33_p1 = scmp.eq.s32.totalorder %s32_s21, 0  ;;  %p43_p2 = scmp.eq.s32.totalorder %s3425_s30, 0 }
  0x50   : > { %p3905_p4 = scmp.eq.s32.totalorder %s3502_s9, 7  ;;  %p3177_p8 = scmp.lt.s32.totalorder %s3425_s30, 8 }
  0x51   : > { %s3605_s23 = scalar_select %p33_p1, %s3421_s29, %s35_s20  }
  0x52   : > { %p3599_p6 = por %p3905_p4, %p42_p12  ;;  %p44_p11 = por %p43_p2, %p42_p12 }
  0x53   : > { %3907 = sst [smem:[#allocation17_spill]] %s3605_s23  ;;  %s288_s24 = sand.u32 1, %s3421_s29  }
  0x54   : > { %s2156_s25 = sshll.u32 %s288_s24, 4  ;;  %s2214_s18 = sshll.u32 %s3425_s30, 8 }
  0x55   : > { %s3908_s0 = sld [smem:[#allocation18_spill]]  ;;  %s292_s19 = scalar_lea.vmem [#allocation2], %s2156_s25 }
  0x56   : > { %s299_s21 = sshll.u32 %s292_s19, 4  ;;  %p3616_p10 = pnand %p3177_p8, %p44_p11  ;;  %s3614_s21 = int_to_ptr.vmem [resolvable:$true] %s299_s21 }
  0x57   : > { %s3623_s26 = scalar_lea.hbm %s3879_s1, %s2214_s18  ;;  %s313_s15 = scalar_lea.vmem [#allocation5], %s2156_s25 }
  0x58   : > { %s3625_s2 = sshll.u32 %s313_s15, 4  ;;  %s3627_s4 = scalar_lea.sflag [#allocation3], %s288_s24  ;;  %s3659_s2 = int_to_ptr.vmem [resolvable:$true] %s3625_s2 }
  0x59   : > { %p3289_p0 = pneg %p3616_p10 }
  0x5b   : > { %s3612_s17 = scalar_lea.hbm %s3908_s0, %s2214_s18  ;;  %s3292_s10 = scalar_lea.hbm %s3908_s0, 2048 }
  0x5c   : > { %s3287_s19 = scalar_lea.hbm %s3612_s17, 256  ;;  %p3293_p7 = scmp.lt.u32.totalorder %s3612_s17, %s3908_s0 }
  0x5d   : > { %p3288_p13 = scmp.ne.s32.totalorder %s3612_s17, %s3287_s19  ;;  %p3294_p9 = scmp.lt.u32.totalorder %s3292_s10, %s3287_s19 }
  0x5e   : > { %p3296_p1 = scmp.lt.u32.totalorder %s3287_s19, %s3612_s17 }
  0x5f   : > { %p3290_p3 = pnand %p3289_p0, %p3288_p13  ;;  %p3295_p12 = por %p3294_p9, %p3293_p7 }
  0x61   : > { %p3291_p5 = pneg %p3290_p3  ;;  %p3297_p2 = por %p3296_p1, %p3295_p12 }
  0x63   : > { %p3298_p4 = pnand %p3297_p2, %p3291_p5 }
  0x65   : > { %3301 = shalt.err (!%p3298_p4)
}
  0x66   : > { %s3302_s24 = scalar_lea.vmem %s3614_s21, 256  ;;  %s3431_s29 = smov [#allocation2]  }
  0x67   : > { %p3303_p8 = scmp.ne.s32.totalorder %s3614_s21, %s3302_s24  ;;  %s3307_s23 = sshll.u32 %s3431_s29, 4  ;;  %s3308_s23 = int_to_ptr.vmem [resolvable:$false] %s3307_s23 }
  0x68   : > { %s3309_s25 = scalar_lea.vmem %s3308_s23, 512  ;;  %p3310_p3 = scmp.lt.s32.totalorder %s3614_s21, %s3308_s23 }
  0x69   : > { %p3305_p11 = pnand %p3303_p8, %p3289_p0  ;;  %p3311_p7 = scmp.lt.s32.totalorder %s3309_s25, %s3302_s24 }
  0x6b   : > { %p3306_p13 = pneg %p3305_p11  ;;  %p3312_p9 = por %p3311_p7, %p3310_p3 }
  0x6d   : > { %p3313_p12 = pnand %p3312_p9, %p3306_p13 }
  0x6f   : > { %3316 = shalt.err (!%p3313_p12)
}
  0x70   : > { %s3910_s15 = smov 8   ;;  %s3911_s19 = smov 128  }
  0x71   : > { %3167 = dma.hbm_to_vmem [thread:$0]  (!%p3616_p10), %s3612_s17, 256, %s3614_s21, %s3627_s4, %s3911_s19, %s3911_s19, %s3910_s15  }
  0x72   : > { %s309_s10 = sand.u32 1, %s3425_s30   ;;  %s3317_s18 = scalar_lea.hbm %s3623_s26, 256 }
  0x73   : > { %s3662_s14 = scalar_lea.sflag [#allocation6], %s309_s10  ;;  %p3318_p5 = scmp.ne.s32.totalorder %s3623_s26, %s3317_s18 }
  0x74   : > { %s3322_s23 = scalar_lea.hbm %s3879_s1, 2048  ;;  %p3323_p4 = scmp.lt.u32.totalorder %s3623_s26, %s3879_s1 }
  0x75   : > { %p3320_p1 = pnand %p3318_p5, %p3289_p0  ;;  %p3324_p8 = scmp.lt.u32.totalorder %s3322_s23, %s3317_s18 }
  0x76   : > { %p3326_p13 = scmp.lt.u32.totalorder %s3317_s18, %s3623_s26 }
  0x77   : > { %p3321_p2 = pneg %p3320_p1  ;;  %p3325_p11 = por %p3324_p8, %p3323_p4 }
  0x79   : > { %p3327_p3 = por %p3326_p13, %p3325_p11 }
  0x7b   : > { %p3328_p7 = pnand %p3327_p3, %p3321_p2 }
  0x7d   : > { %3331 = shalt.err (!%p3328_p7)
}
  0x7e   : > { %s3332_s4 = scalar_lea.vmem %s3659_s2, 256  ;;  %s3432_s17 = smov [#allocation5]  }
  0x7f   : > { %p3333_p9 = scmp.ne.s32.totalorder %s3659_s2, %s3332_s4  ;;  %s3337_s21 = sshll.u32 %s3432_s17, 4  ;;  %s3338_s21 = int_to_ptr.vmem [resolvable:$false] %s3337_s21 }
  0x80   : > { %s3339_s0 = scalar_lea.vmem %s3338_s21, 512  ;;  %p3340_p1 = scmp.lt.s32.totalorder %s3659_s2, %s3338_s21 }
  0x81   : > { %p3335_p12 = pnand %p3333_p9, %p3289_p0  ;;  %p3341_p4 = scmp.lt.s32.totalorder %s3339_s0, %s3332_s4 }
  0x83   : > { %p3336_p5 = pneg %p3335_p12  ;;  %p3342_p8 = por %p3341_p4, %p3340_p1 }
  0x85   : > { %p3343_p11 = pnand %p3342_p8, %p3336_p5 }
  0x87   : > { %3346 = shalt.err (!%p3343_p11)
}
  0x88   : > { %3170 = dma.hbm_to_vmem [thread:$0]  (!%p3616_p10), %s3623_s26, 256, %s3659_s2, %s3662_s14, %s3911_s19, %s3911_s19, %s3910_s15  }
  0x89   : > { %p3912_p0 = scmp.ne.s32.totalorder %s3901_s13, 0 }
  0x8a   : > { %s3694_s10 = sand.u32 (!%p3912_p0), 1, %s3417_s28   ;;  %p3913_p2 = scmp.ne.s32.totalorder (!%p3912_p0), %s3899_s11, 0 }
  0x8b   : > { %332 = sbr.rel (%p3912_p0) target bundleno = 3662 (0xe4e), region = 52  ;;  %s2163_s18 = sshll.u32 (!%p3912_p0), %s3694_s10, 4 }
  0x8c   : > { %s335_s24 = scalar_lea.sflag (!%p3912_p0), [#allocation3], %s3694_s10  ;;  %s3698_s29 = scalar_lea.vmem (!%p3912_p0), [#allocation2], %s2163_s18 }
  0x92   : > { %3392 = dma.done.wait (%p3913_p2), %s335_s24, 256  }
  0x93   : > { %3394 = vsyncadd (%p3913_p2), %s335_s24, 4294967040  ;;  %s343_s2 = sand.u32 1, %s3502_s9   ;;  %s347_s20 = scalar_lea.vmem [#allocation5], %s2163_s18 }
  0x94   : > { %s344_s13 = scalar_lea.sflag [#allocation6], %s343_s2 }
  0x95   : > { %3396 = dma.done.wait (%p3913_p2), %s344_s13, 256  }
  0x96   : > { %3398 = vsyncadd (%p3913_p2), %s344_s13, 4294967040  ;;  %p3914_p10 = scmp.eq.s32.totalorder %s3502_s9, 0 }
  0x98   : > { %3400 = dma.done.wait (%p3914_p10), [#allocation6], 10240   ;;  %p3915_p13 = pmov %p3914_p10 }
  0x99   : > { %p3916_p3 = pmov %p3914_p10 }
  0x9a   : > { %3402 = vsyncadd (%p3915_p13), [#allocation6], 4294957056 }
  0x9b   : > { %3404 = dma.done.wait (%p3916_p3), [#allocation9], 10240   ;;  %p3917_p7 = pmov %p3916_p3 }
  0x9c   : > { %vm397_vm0 = vcmask 130048   ;;  %v395_v0 = vld [vmem:[%s347_s20] sm:$0xff]  ;;  %v396_v1 = vld [vmem:[%s347_s20 + $0x8] sm:$0xff]  ;;  %s3141_s17 = smul.u32 80, %s3694_s10  ;;  %s3433_s26 = smov [#allocation10]  }
  0x9d   : > { %3406 = vsyncadd (%p3917_p7), [#allocation9], 4294957056  ;;  %v3718_v2 = vld [vmem:[%s3698_s29] sm:$0xff]  ;;  %v2801_v3 = vpack.c.bf16 %v396_v1, %v395_v0  ;;  %v480_v5 = vld [vmem:[#allocation7 + $0x8] sm:$0xff]  ;;  %s3142_s18 = smul.u32 1280, %s3502_s9  ;;  %s2023_s9 = scalar_lea.sflag [#allocation4], %s3694_s10 }
  0x9e   : > { %2420 = vmatprep.mubr.msk.f32.mxu0 %vm397_vm0, %v3718_v2  ;;  %v479_v4 = vld [vmem:[#allocation7] sm:$0xff]  ;;  %v481_v7 = vld [vmem:[#allocation7 + $0x10] sm:$0xff]  ;;  %v482_v8 = vld [vmem:[#allocation7 + $0x18] sm:$0xff]  ;;  %s3746_s21 = scalar_lea.vmem [#allocation10], %s3141_s17  ;;  %s3351_s15 = sshll.u32 %s3433_s26, 4  ;;  %s3352_s15 = int_to_ptr.vmem [resolvable:$false] %s3351_s15 }
  0x9f   : > { %v2805_v6 = vpack.c.bf16 %v480_v5, %v479_v4  ;;  %2802 = vmatprep.subr.bf16.mxu0 %v2801_v3  ;;  %v2809_v9 = vpack.c.bf16 %v482_v8, %v481_v7  ;;  %v483_v10 = vld [vmem:[#allocation7 + $0x20] sm:$0xff]  ;;  %v484_v11 = vld [vmem:[#allocation7 + $0x28] sm:$0xff]  ;;  %v485_v14 = vld [vmem:[#allocation7 + $0x30] sm:$0xff]  ;;  %s2036_s24 = sshll.u32 %s3746_s21, 4  ;;  %s3831_s20 = scalar_lea.hbm %s3886_s8, %s3142_s18  ;;  %s3833_s24 = int_to_ptr.vmem [resolvable:$true] %s2036_s24 }
  0xa0   : > { %2804 = vmatpush3.bf16.msra.mxu0 %v2801_v3  ;;  %v3723_v12 = vld [vmem:[%s3698_s29 + $0x8] sm:$0xff]  ;;  %v2813_v13 = vpack.c.bf16 %v484_v11, %v483_v10  ;;  %v487_v17 = vld [vmem:[#allocation7 + $0x40] sm:$0xff]  ;;  %v489_v20 = vld [vmem:[#allocation7 + $0x50] sm:$0xff]  ;;  %s3347_s11 = scalar_lea.vmem %s3833_s24, 1280  ;;  %p3354_p1 = scmp.lt.s32.totalorder %s3833_s24, %s3352_s15 }
  0xa1   : > { %2806 = vmatprep.subr.bf16.mxu1 %v2805_v6  ;;  %v486_v15 = vld [vmem:[#allocation7 + $0x38] sm:$0xff]  ;;  %v488_v18 = vld [vmem:[#allocation7 + $0x48] sm:$0xff]  ;;  %v491_v23 = vld [vmem:[#allocation7 + $0x60] sm:$0xff]  ;;  %p3348_p9 = scmp.ne.s32.totalorder %s3833_s24, %s3347_s11 }
  0xa2   : > { %2808 = vmatpush3.bf16.msra.mxu1 %v2805_v6  ;;  %v2817_v16 = vpack.c.bf16 %v486_v15, %v485_v14  ;;  %v2821_v19 = vpack.c.bf16 %v488_v18, %v487_v17  ;;  %v490_v21 = vld [vmem:[#allocation7 + $0x58] sm:$0xff]  ;;  %v492_v24 = vld [vmem:[#allocation7 + $0x68] sm:$0xff]  ;;  %v493_v26 = vld [vmem:[#allocation7 + $0x70] sm:$0xff] }
  0xa3   : > { %2810 = vmatprep.subr.bf16.mxu1 %v2809_v9  ;;  %2421 = vmatmul.mubr.msk.f32.vlgmr.msra.gmra.mrb[0].mxu0 %vm397_vm0, %v3723_v12  ;;  %v2825_v22 = vpack.c.bf16 %v490_v21, %v489_v20  ;;  %v2829_v25 = vpack.c.bf16 %v492_v24, %v491_v23  ;;  %v494_v27 = vld [vmem:[#allocation7 + $0x78] sm:$0xff]  ;;  %v579_v29 = vld [vmem:[#allocation8] sm:$0xff]  ;;  %v580_v30 = vld [vmem:[#allocation8 + $0x8] sm:$0xff]  ;;  %p3349_p12 = pnand %p3348_p9, %p3599_p6 }
  0xa4   : > { %v2833_v28 = vpack.c.bf16 %v494_v27, %v493_v26  ;;  %v581_v31 = vld [vmem:[#allocation8 + $0x10] sm:$0xff]  ;;  %v2837_v32 = vpack.c.bf16 %v580_v30, %v579_v29  ;;  %v582_v33 = vld [vmem:[#allocation8 + $0x18] sm:$0xff]  ;;  %v583_v35 = vld [vmem:[#allocation8 + $0x20] sm:$0xff] }
  0xa5   : > { %v2841_v34 = vpack.c.bf16 %v582_v33, %v581_v31  ;;  %v584_v36 = vld [vmem:[#allocation8 + $0x28] sm:$0xff]  ;;  %v585_v38 = vld [vmem:[#allocation8 + $0x30] sm:$0xff]  ;;  %v586_v39 = vld [vmem:[#allocation8 + $0x38] sm:$0xff]  ;;  %p3350_p5 = pneg %p3349_p12 }
  0xa6   : > { %2812 = vmatpush3.bf16.msra.mxu1 %v2809_v9  ;;  %2838 = vmatprep.subr.bf16.mxu0 %v2837_v32  ;;  %v2845_v37 = vpack.c.bf16 %v584_v36, %v583_v35  ;;  %v2849_v40 = vpack.c.bf16 %v586_v39, %v585_v38  ;;  %v587_v41 = vld [vmem:[#allocation8 + $0x40] sm:$0xff]  ;;  %v588_v42 = vld [vmem:[#allocation8 + $0x48] sm:$0xff]  ;;  %v589_v44 = vld [vmem:[#allocation8 + $0x50] sm:$0xff] }
  0xa7   : > { %2814 = vmatprep.subr.bf16.mxu1 %v2813_v13  ;;  %2840 = vmatpush3.bf16.msra.mxu0 %v2837_v32  ;;  %v2853_v43 = vpack.c.bf16 %v588_v42, %v587_v41  ;;  %v590_v45 = vld [vmem:[#allocation8 + $0x58] sm:$0xff]  ;;  %v591_v47 = vld [vmem:[#allocation8 + $0x60] sm:$0xff]  ;;  %v592_v48 = vld [vmem:[#allocation8 + $0x68] sm:$0xff] }
  0xa8   : > { %2842 = vmatprep.subr.bf16.mxu0 %v2841_v34  ;;  %v2857_v46 = vpack.c.bf16 %v590_v45, %v589_v44  ;;  %v2861_v49 = vpack.c.bf16 %v592_v48, %v591_v47  ;;  %v593_v52 = vld [vmem:[#allocation8 + $0x70] sm:$0xff]  ;;  %v594_v53 = vld [vmem:[#allocation8 + $0x78] sm:$0xff]  ;;  %v2169_v55 = vld [vmem:[%s3881_s3] ss:$0 sm:$0xff] }
  0xa9   : > { %v2865_v54 = vpack.c.bf16 %v594_v53, %v593_v52  ;;  %v798_v62 = vld [vmem:[#allocation7 + $0x80] sm:$0xff]  ;;  %v799_v63 = vld [vmem:[#allocation7 + $0x88] sm:$0xff]  ;;  %v800_v0 = vld [vmem:[#allocation7 + $0x90] sm:$0xff]  ;;  %v706_v52 = vlaneseq }
  0xaa   : > { %2816 = vmatpush3.bf16.msra.mxu1 %v2813_v13  ;;  %v2873_v1 = vpack.c.bf16 %v799_v63, %v798_v62  ;;  %v801_v3 = vld [vmem:[#allocation7 + $0x98] sm:$0xff]  ;;  %v802_v5 = vld [vmem:[#allocation7 + $0xa0] sm:$0xff]  ;;  %v803_v6 = vld [vmem:[#allocation7 + $0xa8] sm:$0xff] }
  0xab   : > { %2818 = vmatprep.subr.bf16.mxu1 %v2817_v16  ;;  %2844 = vmatpush3.bf16.msra.mxu0 %v2841_v34  ;;  %v2877_v4 = vpack.c.bf16 %v801_v3, %v800_v0  ;;  %v2881_v7 = vpack.c.bf16 %v803_v6, %v802_v5  ;;  %v804_v8 = vld [vmem:[#allocation7 + $0xb0] sm:$0xff]  ;;  %v805_v9 = vld [vmem:[#allocation7 + $0xb8] sm:$0xff]  ;;  %v806_v11 = vld [vmem:[#allocation7 + $0xc0] sm:$0xff]  ;;  %v707_v53 = vshrl.u32 %v706_v52, 7 }
  0xac   : > { %2846 = vmatprep.subr.bf16.mxu0 %v2845_v37  ;;  %v2885_v10 = vpack.c.bf16 %v805_v9, %v804_v8  ;;  %v807_v13 = vld [vmem:[#allocation7 + $0xc8] sm:$0xff]  ;;  %v808_v15 = vld [vmem:[#allocation7 + $0xd0] sm:$0xff]  ;;  %v810_v18 = vld [vmem:[#allocation7 + $0xe0] sm:$0xff] }
  0xad   : > { %v2889_v14 = vpack.c.bf16 %v807_v13, %v806_v11  ;;  %v812_v21 = vld [vmem:[#allocation7 + $0xf0] sm:$0xff]  ;;  %v2170_v24 = vld [vmem:[%s3883_s5] ss:$0 sm:$0xff]  ;;  %v901_v6 = vld [vmem:[#allocation8 + $0x88] sm:$0xff] }
  0xae   : > { %2820 = vmatpush3.bf16.msra.mxu1 %v2817_v16  ;;  %v809_v16 = vld [vmem:[#allocation7 + $0xd8] sm:$0xff]  ;;  %v900_v5 = vld [vmem:[#allocation8 + $0x80] sm:$0xff]  ;;  %v905_v13 = vld [vmem:[#allocation8 + $0xa8] sm:$0xff] }
  0xaf   : > { %2822 = vmatprep.subr.bf16.mxu1 %v2821_v19  ;;  %2848 = vmatpush3.bf16.msra.mxu0 %v2845_v37  ;;  %v2893_v17 = vpack.c.bf16 %v809_v16, %v808_v15  ;;  %v2905_v8 = vpack.c.bf16 %v901_v6, %v900_v5  ;;  %v903_v9 = vld [vmem:[#allocation8 + $0x98] sm:$0xff]  ;;  %v904_v11 = vld [vmem:[#allocation8 + $0xa0] sm:$0xff]  ;;  %v906_v15 = vld [vmem:[#allocation8 + $0xb0] sm:$0xff] }
  0xb0   : > { %2850 = vmatprep.subr.bf16.mxu0 %v2849_v40  ;;  %v907_v16 = vld [vmem:[#allocation8 + $0xb8] sm:$0xff]  ;;  %v1132_v52 = vld [vmem:[#allocation7 + $0x148] sm:$0xff] }
  0xb2   : > { %2824 = vmatpush3.bf16.msra.mxu1 %v2821_v19  ;;  %v811_v19 = vld [vmem:[#allocation7 + $0xe8] sm:$0xff] }
  0xb3   : > { %2826 = vmatprep.subr.bf16.mxu1 %v2825_v22  ;;  %2852 = vmatpush3.bf16.msra.mxu0 %v2849_v40  ;;  %v2897_v20 = vpack.c.bf16 %v811_v19, %v810_v18  ;;  %v908_v18 = vld [vmem:[#allocation8 + $0xc0] sm:$0xff]  ;;  %v909_v19 = vld [vmem:[#allocation8 + $0xc8] sm:$0xff] }
  0xb4   : > { %2854 = vmatprep.subr.bf16.mxu0 %v2853_v43 }
  0xb6   : > { %2828 = vmatpush3.bf16.msra.mxu1 %v2825_v22  ;;  %v813_v22 = vld [vmem:[#allocation7 + $0xf8] sm:$0xff] }
  0xb7   : > { %2830 = vmatprep.subr.bf16.mxu1 %v2829_v25  ;;  %2856 = vmatpush3.bf16.msra.mxu0 %v2853_v43  ;;  %v2901_v23 = vpack.c.bf16 %v813_v22, %v812_v21  ;;  %v910_v21 = vld [vmem:[#allocation8 + $0xd0] sm:$0xff]  ;;  %v911_v22 = vld [vmem:[#allocation8 + $0xd8] sm:$0xff] }
  0xb8   : > { %2858 = vmatprep.subr.bf16.mxu0 %v2857_v46 }
  0xba   : > { %2832 = vmatpush3.bf16.msra.mxu1 %v2829_v25 }
  0xbb   : > { %2834 = vmatprep.subr.bf16.mxu1 %v2833_v28  ;;  %2860 = vmatpush3.bf16.msra.mxu0 %v2857_v46 }
  0xbc   : > { %2862 = vmatprep.subr.bf16.mxu0 %v2861_v49 }
  0xbe   : > { %2836 = vmatpush3.bf16.msra.mxu1 %v2833_v28 }
  0xbf   : > { %2864 = vmatpush3.bf16.msra.mxu0 %v2861_v49 }
  0xc0   : > { %2866 = vmatprep.subr.bf16.mxu0 %v2865_v54 }
  0xc3   : > { %2868 = vmatpush3.bf16.msra.mxu0 %v2865_v54  ;;  %v701_v54 = vld [vmem:[%s3884_s6] sm:$0x1] }
  0xc4   : > { %2874 = vmatprep.subr.bf16.mxu0 %v2873_v1 }
 0x176   : > { %v2422_v50 = vpop.f32.mrb[0].mxu0 }
 0x177   : > { %v470_v51 = vpop.f32.mrb[1].mxu0 }
 0x178   : > { %2455 = vmatprep.mubr.f32.mxu1 %v470_v51 }
 0x179   : > { %2456 = vmatmul.mubr.f32.vlgmr.msra.gmra.mrb[0].mxu1 %v2422_v50 }
 0x17a   : > { %2497 = vmatprep.mubr.msk.f32.mxu1 %vm397_vm0, %v3718_v2 }
 0x24c   : > { %v2457_v56 = vpop.f32.mrb[0].mxu1 }
 0x24d   : > { %v574_v57 = vadd.f32 %v2457_v56, %v2169_v55  ;;  %v568_v58 = vpop.f32.mrb[1].mxu1 }
 0x24e   : > { %v569_v59 = vadd.f32 %v2169_v55, %v568_v58  ;;  %v3738_v55 = vsub.s32 0, %v707_v53  ;;  %v703_v58 = vld [vmem:[%s3885_s7] sm:$0x1] }
 0x24f   : > { %v578_v61 = vmax.f32 %v574_v57, 0.0 }
 0x250   : > { %v577_v60 = vmax.f32 %v569_v59, 0.0 }
 0x252   : > { %2490 = vmatprep.mubr.f32.mxu0 %v577_v60 }
 0x253   : > { %2491 = vmatmul.mubr.f32.vlgmr.msra.gmra.mrb[2].mxu0 %v578_v61 }
 0x254   : > { %2876 = vmatpush3.bf16.msra.mxu0 %v2873_v1 }
 0x255   : > { %2878 = vmatprep.subr.bf16.mxu0 %v2877_v4 }
 0x258   : > { %2880 = vmatpush3.bf16.msra.mxu0 %v2877_v4 }
 0x259   : > { %2882 = vmatprep.subr.bf16.mxu0 %v2881_v7 }
 0x25c   : > { %2884 = vmatpush3.bf16.msra.mxu0 %v2881_v7  ;;  %v902_v7 = vld [vmem:[#allocation8 + $0x90] sm:$0xff] }
 0x25d   : > { %2886 = vmatprep.subr.bf16.mxu0 %v2885_v10 }
 0x260   : > { %2888 = vmatpush3.bf16.msra.mxu0 %v2885_v10  ;;  %v2909_v10 = vpack.c.bf16 %v903_v9, %v902_v7 }
 0x261   : > { %2890 = vmatprep.subr.bf16.mxu0 %v2889_v14 }
 0x264   : > { %2892 = vmatpush3.bf16.msra.mxu0 %v2889_v14  ;;  %v2913_v14 = vpack.c.bf16 %v905_v13, %v904_v11 }
 0x265   : > { %2894 = vmatprep.subr.bf16.mxu0 %v2893_v17 }
 0x268   : > { %2896 = vmatpush3.bf16.msra.mxu0 %v2893_v17  ;;  %v2917_v17 = vpack.c.bf16 %v907_v16, %v906_v15 }
 0x269   : > { %2898 = vmatprep.subr.bf16.mxu0 %v2897_v20 }
 0x26c   : > { %2900 = vmatpush3.bf16.msra.mxu0 %v2897_v20  ;;  %v2921_v20 = vpack.c.bf16 %v909_v19, %v908_v18 }
 0x26d   : > { %2902 = vmatprep.subr.bf16.mxu0 %v2901_v23 }
 0x270   : > { %2904 = vmatpush3.bf16.msra.mxu0 %v2901_v23  ;;  %v2925_v23 = vpack.c.bf16 %v911_v22, %v910_v21 }
 0x326   : > { %v2492_v25 = vpop.f32.mrb[2].mxu0 }
 0x327   : > { %v674_v26 = vadd.f32 %v2492_v25, %v2170_v24  ;;  %v668_v27 = vpop.f32.mrb[3].mxu0  ;;  %v913_v25 = vld [vmem:[#allocation8 + $0xe8] sm:$0xff] }
 0x328   : > { %v669_v28 = vadd.f32 %v2170_v24, %v668_v27  ;;  %v912_v24 = vld [vmem:[#allocation8 + $0xe0] sm:$0xff] }
 0x329   : > { %v678_v29 = vmax.f32 %v674_v26, 0.0  ;;  %v2929_v26 = vpack.c.bf16 %v913_v25, %v912_v24 }
 0x32a   : > { %v677_v30 = vmax.f32 %v669_v28, 0.0 }
 0x32b   : > { %v687_v31 = vmul.f32 %v678_v29, %v678_v29 }
 0x32c   : > { %v679_v32 = vadd.f32 %v678_v29, %v677_v30  ;;  %v686_v33 = vmul.f32 %v677_v30, %v677_v30 }
 0x32e   : > { %v680_v34 = vrot.slane %v679_v32, 4  ;;  %v688_v35 = vadd.f32 %v687_v31, %v686_v33 }
 0x330   : > { %v681_v36 = vadd.f32 %v680_v34, %v679_v32  ;;  %v689_v37 = vrot.slane %v688_v35, 4  ;;  %v2174_v32 = vld [vmem:[%s3881_s3 + $0x1] ss:$0 sm:$0xff] }
 0x332   : > { %v682_v38 = vrot.slane %v681_v36, 2  ;;  %v690_v39 = vadd.f32 %v689_v37, %v688_v35 }
 0x334   : > { %v683_v40 = vadd.f32 %v682_v38, %v681_v36  ;;  %v691_v41 = vrot.slane %v690_v39, 2 }
 0x336   : > { %v684_v42 = vrot.slane %v683_v40, 1  ;;  %v692_v43 = vadd.f32 %v691_v41, %v690_v39  ;;  %v1123_v39 = vld [vmem:[#allocation7 + $0x100] sm:$0xff]  ;;  %v1125_v41 = vld [vmem:[#allocation7 + $0x110] sm:$0xff] }
 0x338   : > { %v685_v44 = vadd.f32 %v684_v42, %v683_v40  ;;  %v693_v45 = vrot.slane %v692_v43, 1  ;;  %v1124_v40 = vld [vmem:[#allocation7 + $0x108] sm:$0xff] }
 0x339   : > { %v2941_v42 = vpack.c.bf16 %v1124_v40, %v1123_v39 }
 0x33a   : > { %v694_v46 = vadd.f32 %v693_v45, %v692_v43  ;;  %v695_v47 = vmul.f32 0.0625, %v685_v44  ;;  %v1126_v43 = vld [vmem:[#allocation7 + $0x118] sm:$0xff]  ;;  %v1127_v45 = vld [vmem:[#allocation7 + $0x120] sm:$0xff] }
 0x33b   : > { %v2945_v44 = vpack.c.bf16 %v1126_v43, %v1125_v41  ;;  %v1225_v43 = vld [vmem:[#allocation8 + $0x100] sm:$0xff] }
 0x33c   : > { %v696_v48 = vmul.f32 0.0625, %v694_v46  ;;  %v697_v49 = vmul.f32 %v695_v47, %v695_v47  ;;  %v1128_v46 = vld [vmem:[#allocation7 + $0x128] sm:$0xff] }
 0x33e   : > { %v698_v50 = vsub.f32 %v696_v48, %v697_v49  ;;  %v1129_v48 = vld [vmem:[#allocation7 + $0x130] sm:$0xff]  ;;  %v1130_v49 = vld [vmem:[#allocation7 + $0x138] sm:$0xff] }
 0x340   : > { %v699_v51 = vadd.f32 1e-05, %v698_v50  ;;  %v2953_v50 = vpack.c.bf16 %v1130_v49, %v1129_v48  ;;  %v1229_v49 = vld [vmem:[#allocation8 + $0x120] sm:$0xff] }
 0x342   : > { %3219 = vrsqrt.f32 %v699_v51  ;;  %v1131_v51 = vld [vmem:[#allocation7 + $0x140] sm:$0xff] }
 0x343   : > { %v2957_v53 = vpack.c.bf16 %v1132_v52, %v1131_v51  ;;  %v1231_v52 = vld [vmem:[#allocation8 + $0x130] sm:$0xff] }
 0x34c   : > { %v3220_v56 = vpop.eup %3219 }
 0x34d   : > { %v702_v57 = vmul.f32 %v3220_v56, %v701_v54  ;;  %v1133_v54 = vld [vmem:[#allocation7 + $0x150] sm:$0xff]  ;;  %v1134_v56 = vld [vmem:[#allocation7 + $0x158] sm:$0xff] }
 0x34f   : > { %v704_v59 = vmul.f32 %v702_v57, %v695_v47  ;;  %v709_v60 = vrot.slane %v702_v57, %v3738_v55  ;;  %v2949_v47 = vpack.c.bf16 %v1128_v46, %v1127_v45  ;;  %v2961_v57 = vpack.c.bf16 %v1134_v56, %v1133_v54  ;;  %v1227_v45 = vld [vmem:[#allocation8 + $0x110] sm:$0xff]  ;;  %v1233_v56 = vld [vmem:[#allocation8 + $0x140] sm:$0xff] }
 0x351   : > { %v710_v61 = vmul.f32 %v709_v60, %v677_v30  ;;  %v705_v62 = vsub.f32 %v703_v58, %v704_v59  ;;  %v711_v63 = vmul.f32 %v709_v60, %v678_v29  ;;  %v914_v29 = vld [vmem:[#allocation8 + $0xf0] sm:$0xff]  ;;  %v915_v30 = vld [vmem:[#allocation8 + $0xf8] sm:$0xff]  ;;  %v1135_v58 = vld [vmem:[#allocation7 + $0x160] sm:$0xff] }
 0x352   : > { %v2933_v31 = vpack.c.bf16 %v915_v30, %v914_v29  ;;  %v1136_v59 = vld [vmem:[#allocation7 + $0x168] sm:$0xff]  ;;  %v2177_v30 = vld [vmem:[%s3884_s6 + $0x1] sm:$0x1] }
 0x353   : > { %v716_v0 = vrot.slane %v705_v62, %v3738_v55  ;;  %v2965_v60 = vpack.c.bf16 %v1136_v59, %v1135_v58  ;;  %v1138_v62 = vld [vmem:[#allocation7 + $0x178] sm:$0xff]  ;;  %v1235_v59 = vld [vmem:[#allocation8 + $0x150] sm:$0xff] }
 0x355   : > { %v718_v1 = vadd.f32 %v716_v0, %v710_v61  ;;  %v719_v3 = vadd.f32 %v716_v0, %v711_v63  ;;  %v1137_v61 = vld [vmem:[#allocation7 + $0x170] sm:$0xff]  ;;  %v2176_v0 = vld [vmem:[%s3883_s5 + $0x1] ss:$0 sm:$0xff] }
 0x356   : > { %v2969_v63 = vpack.c.bf16 %v1138_v62, %v1137_v61  ;;  %v1237_v62 = vld [vmem:[#allocation8 + $0x160] sm:$0xff] }
 0x357   : > { %720 = vst [vmem:[%s3746_s21] sm:$0xff] %v718_v1  ;;  %721 = vst [vmem:[%s3746_s21 + $0x8] sm:$0xff] %v719_v3  ;;  %v2869_v4 = vpack.c.bf16 %v719_v3, %v718_v1 }
 0x359   : > { %2870 = vmatprep.subr.bf16.mxu1 %v2869_v4 }
 0x35a   : > { %2872 = vmatpush3.bf16.msra.mxu1 %v2869_v4 }
 0x35b   : > { %2906 = vmatprep.subr.bf16.mxu1 %v2905_v8 }
 0x35d   : > { %2498 = vmatmul.mubr.msk.f32.vlgmr.msra.gmra.mrb[2].mxu1 %vm397_vm0, %v3723_v12 }
 0x35e   : > { %2908 = vmatpush3.bf16.msra.mxu1 %v2905_v8 }
 0x35f   : > { %2910 = vmatprep.subr.bf16.mxu1 %v2909_v10 }
 0x362   : > { %2912 = vmatpush3.bf16.msra.mxu1 %v2909_v10 }
 0x363   : > { %2914 = vmatprep.subr.bf16.mxu1 %v2913_v14 }
 0x366   : > { %2916 = vmatpush3.bf16.msra.mxu1 %v2913_v14 }
 0x367   : > { %2918 = vmatprep.subr.bf16.mxu1 %v2917_v17 }
 0x36a   : > { %2920 = vmatpush3.bf16.msra.mxu1 %v2917_v17 }
 0x36b   : > { %2922 = vmatprep.subr.bf16.mxu1 %v2921_v20 }
 0x36e   : > { %2924 = vmatpush3.bf16.msra.mxu1 %v2921_v20 }
 0x36f   : > { %2926 = vmatprep.subr.bf16.mxu1 %v2925_v23 }
 0x372   : > { %2928 = vmatpush3.bf16.msra.mxu1 %v2925_v23 }
 0x373   : > { %2930 = vmatprep.subr.bf16.mxu1 %v2929_v26 }
 0x376   : > { %2932 = vmatpush3.bf16.msra.mxu1 %v2929_v26 }
 0x377   : > { %2934 = vmatprep.subr.bf16.mxu1 %v2933_v31 }
 0x37a   : > { %2936 = vmatpush3.bf16.msra.mxu1 %v2933_v31 }
 0x37b   : > { %2942 = vmatprep.subr.bf16.mxu1 %v2941_v42 }
 0x430   : > { %v2499_v27 = vpop.f32.mrb[2].mxu1 }
 0x431   : > { %v788_v28 = vpop.f32.mrb[3].mxu1 }
 0x432   : > { %2532 = vmatprep.mubr.f32.mxu0 %v788_v28 }
 0x433   : > { %2533 = vmatmul.mubr.f32.vlgmr.msra.gmra.mrb[4].mxu0 %v2499_v27 }
 0x434   : > { %2574 = vmatprep.mubr.msk.f32.mxu0 %vm397_vm0, %v3718_v2 }
 0x506   : > { %v2534_v33 = vpop.f32.mrb[4].mxu0 }
 0x507   : > { %v894_v34 = vadd.f32 %v2534_v33, %v2174_v32  ;;  %v888_v35 = vpop.f32.mrb[5].mxu0  ;;  %v2178_v33 = vld [vmem:[%s3885_s7 + $0x1] sm:$0x1] }
 0x508   : > { %v889_v36 = vadd.f32 %v2174_v32, %v888_v35 }
 0x509   : > { %v898_v38 = vmax.f32 %v894_v34, 0.0 }
 0x50a   : > { %v897_v37 = vmax.f32 %v889_v36, 0.0 }
 0x50c   : > { %2567 = vmatprep.mubr.f32.mxu1 %v897_v37 }
 0x50d   : > { %2568 = vmatmul.mubr.f32.vlgmr.msra.gmra.mrb[4].mxu1 %v898_v38 }
 0x50e   : > { %2944 = vmatpush3.bf16.msra.mxu1 %v2941_v42 }
 0x50f   : > { %2946 = vmatprep.subr.bf16.mxu1 %v2945_v44 }
 0x512   : > { %2948 = vmatpush3.bf16.msra.mxu1 %v2945_v44  ;;  %v1226_v44 = vld [vmem:[#allocation8 + $0x108] sm:$0xff] }
 0x513   : > { %2950 = vmatprep.subr.bf16.mxu1 %v2949_v47  ;;  %v2973_v46 = vpack.c.bf16 %v1226_v44, %v1225_v43 }
 0x516   : > { %2952 = vmatpush3.bf16.msra.mxu1 %v2949_v47  ;;  %v1228_v47 = vld [vmem:[#allocation8 + $0x118] sm:$0xff] }
 0x517   : > { %2954 = vmatprep.subr.bf16.mxu1 %v2953_v50  ;;  %v2977_v48 = vpack.c.bf16 %v1228_v47, %v1227_v45 }
 0x51a   : > { %2956 = vmatpush3.bf16.msra.mxu1 %v2953_v50  ;;  %v1230_v50 = vld [vmem:[#allocation8 + $0x128] sm:$0xff] }
 0x51b   : > { %2958 = vmatprep.subr.bf16.mxu1 %v2957_v53  ;;  %v2981_v51 = vpack.c.bf16 %v1230_v50, %v1229_v49 }
 0x51e   : > { %2960 = vmatpush3.bf16.msra.mxu1 %v2957_v53  ;;  %v1232_v53 = vld [vmem:[#allocation8 + $0x138] sm:$0xff] }
 0x51f   : > { %2962 = vmatprep.subr.bf16.mxu1 %v2961_v57  ;;  %v2985_v54 = vpack.c.bf16 %v1232_v53, %v1231_v52 }
 0x522   : > { %2964 = vmatpush3.bf16.msra.mxu1 %v2961_v57  ;;  %v1234_v57 = vld [vmem:[#allocation8 + $0x148] sm:$0xff] }
 0x523   : > { %2966 = vmatprep.subr.bf16.mxu1 %v2965_v60  ;;  %v2989_v58 = vpack.c.bf16 %v1234_v57, %v1233_v56 }
 0x526   : > { %2968 = vmatpush3.bf16.msra.mxu1 %v2965_v60  ;;  %v1236_v60 = vld [vmem:[#allocation8 + $0x158] sm:$0xff] }
 0x527   : > { %2970 = vmatprep.subr.bf16.mxu1 %v2969_v63  ;;  %v2993_v61 = vpack.c.bf16 %v1236_v60, %v1235_v59 }
 0x52a   : > { %2972 = vmatpush3.bf16.msra.mxu1 %v2969_v63  ;;  %v1238_v63 = vld [vmem:[#allocation8 + $0x168] sm:$0xff] }
 0x5e0   : > { %v2569_v1 = vpop.f32.mrb[4].mxu1 }
 0x5e1   : > { %v996_v3 = vadd.f32 %v2569_v1, %v2176_v0  ;;  %v990_v4 = vpop.f32.mrb[5].mxu1 }
 0x5e2   : > { %v991_v5 = vadd.f32 %v2176_v0, %v990_v4  ;;  %v2997_v0 = vpack.c.bf16 %v1238_v63, %v1237_v62  ;;  %v1239_v4 = vld [vmem:[#allocation8 + $0x170] sm:$0xff] }
 0x5e3   : > { %v1000_v6 = vmax.f32 %v996_v3, 0.0 }
 0x5e4   : > { %v999_v7 = vmax.f32 %v991_v5, 0.0  ;;  %v1240_v5 = vld [vmem:[#allocation8 + $0x178] sm:$0xff] }
 0x5e5   : > { %v1009_v8 = vmul.f32 %v1000_v6, %v1000_v6 }
 0x5e6   : > { %v1001_v9 = vadd.f32 %v1000_v6, %v999_v7  ;;  %v1008_v10 = vmul.f32 %v999_v7, %v999_v7 }
 0x5e8   : > { %v1002_v11 = vrot.slane %v1001_v9, 4  ;;  %v1010_v13 = vadd.f32 %v1009_v8, %v1008_v10 }
 0x5ea   : > { %v1003_v14 = vadd.f32 %v1002_v11, %v1001_v9  ;;  %v1011_v15 = vrot.slane %v1010_v13, 4 }
 0x5ec   : > { %v1004_v16 = vrot.slane %v1003_v14, 2  ;;  %v1012_v17 = vadd.f32 %v1011_v15, %v1010_v13  ;;  %v1448_v15 = vld [vmem:[#allocation7 + $0x180] sm:$0xff] }
 0x5ee   : > { %v1005_v18 = vadd.f32 %v1004_v16, %v1003_v14  ;;  %v1013_v19 = vrot.slane %v1012_v17, 2  ;;  %v1449_v16 = vld [vmem:[#allocation7 + $0x188] sm:$0xff] }
 0x5f0   : > { %v1006_v20 = vrot.slane %v1005_v18, 1  ;;  %v1014_v21 = vadd.f32 %v1013_v19, %v1012_v17  ;;  %v3009_v17 = vpack.c.bf16 %v1449_v16, %v1448_v15 }
 0x5f2   : > { %v1007_v22 = vadd.f32 %v1006_v20, %v1005_v18  ;;  %v1015_v23 = vrot.slane %v1014_v21, 1  ;;  %v1451_v18 = vld [vmem:[#allocation7 + $0x198] sm:$0xff]  ;;  %v1452_v20 = vld [vmem:[#allocation7 + $0x1a0] sm:$0xff] }
 0x5f4   : > { %v1016_v24 = vadd.f32 %v1015_v23, %v1014_v21  ;;  %v1017_v25 = vmul.f32 0.0625, %v1007_v22  ;;  %v1453_v21 = vld [vmem:[#allocation7 + $0x1a8] sm:$0xff]  ;;  %v1454_v23 = vld [vmem:[#allocation7 + $0x1b0] sm:$0xff] }
 0x5f5   : > { %v3017_v22 = vpack.c.bf16 %v1453_v21, %v1452_v20  ;;  %v1553_v21 = vld [vmem:[#allocation8 + $0x198] sm:$0xff] }
 0x5f6   : > { %v1018_v26 = vmul.f32 0.0625, %v1016_v24  ;;  %v1019_v27 = vmul.f32 %v1017_v25, %v1017_v25  ;;  %v1455_v24 = vld [vmem:[#allocation7 + $0x1b8] sm:$0xff] }
 0x5f8   : > { %v1020_v28 = vsub.f32 %v1018_v26, %v1019_v27  ;;  %v1456_v26 = vld [vmem:[#allocation7 + $0x1c0] sm:$0xff]  ;;  %v1457_v27 = vld [vmem:[#allocation7 + $0x1c8] sm:$0xff] }
 0x5fa   : > { %v1021_v29 = vadd.f32 1e-05, %v1020_v28  ;;  %v3025_v28 = vpack.c.bf16 %v1457_v27, %v1456_v26  ;;  %v1556_v26 = vld [vmem:[#allocation8 + $0x1b0] sm:$0xff]  ;;  %v1557_v27 = vld [vmem:[#allocation8 + $0x1b8] sm:$0xff] }
 0x5fc   : > { %3221 = vrsqrt.f32 %v1021_v29  ;;  %v1458_v29 = vld [vmem:[#allocation7 + $0x1d0] sm:$0xff] }
 0x606   : > { %v3222_v31 = vpop.eup %3221 }
 0x607   : > { %v1025_v32 = vmul.f32 %v3222_v31, %v2177_v30  ;;  %v1459_v30 = vld [vmem:[#allocation7 + $0x1d8] sm:$0xff] }
 0x608   : > { %v3029_v31 = vpack.c.bf16 %v1459_v30, %v1458_v29  ;;  %v1558_v29 = vld [vmem:[#allocation8 + $0x1c0] sm:$0xff]  ;;  %v1559_v30 = vld [vmem:[#allocation8 + $0x1c8] sm:$0xff] }
 0x609   : > { %v1028_v34 = vmul.f32 %v1025_v32, %v1017_v25  ;;  %v1033_v35 = vrot.slane %v1025_v32, %v3738_v55  ;;  %v3021_v25 = vpack.c.bf16 %v1455_v24, %v1454_v23  ;;  %v1460_v32 = vld [vmem:[#allocation7 + $0x1e0] sm:$0xff]  ;;  %v1555_v24 = vld [vmem:[#allocation8 + $0x1a8] sm:$0xff] }
 0x60a   : > { %v1554_v23 = vld [vmem:[#allocation8 + $0x1a0] sm:$0xff] }
 0x60b   : > { %v1034_v36 = vmul.f32 %v1033_v35, %v999_v7  ;;  %v1029_v37 = vsub.f32 %v2178_v33, %v1028_v34  ;;  %v1035_v38 = vmul.f32 %v1033_v35, %v1000_v6  ;;  %v3001_v6 = vpack.c.bf16 %v1240_v5, %v1239_v4  ;;  %v2184_v7 = vld [vmem:[%s3881_s3 + $0x2] ss:$0 sm:$0xff]  ;;  %v1461_v33 = vld [vmem:[#allocation7 + $0x1e8] sm:$0xff]  ;;  %v1462_v35 = vld [vmem:[#allocation7 + $0x1f0] sm:$0xff] }
 0x60c   : > { %v3033_v34 = vpack.c.bf16 %v1461_v33, %v1460_v32  ;;  %v2187_v4 = vld [vmem:[%s3884_s6 + $0x2] sm:$0x1]  ;;  %v1561_v32 = vld [vmem:[#allocation8 + $0x1d8] sm:$0xff] }
 0x60d   : > { %v1040_v39 = vrot.slane %v1029_v37, %v3738_v55 }
 0x60f   : > { %v1042_v40 = vadd.f32 %v1040_v39, %v1034_v36  ;;  %v1043_v41 = vadd.f32 %v1040_v39, %v1035_v38  ;;  %v1463_v36 = vld [vmem:[#allocation7 + $0x1f8] sm:$0xff]  ;;  %v2186_v38 = vld [vmem:[%s3883_s5 + $0x2] ss:$0 sm:$0xff] }
 0x610   : > { %v3037_v37 = vpack.c.bf16 %v1463_v36, %v1462_v35  ;;  %v1563_v35 = vld [vmem:[#allocation8 + $0x1e8] sm:$0xff] }
 0x611   : > { %2179 = vst [vmem:[%s3746_s21 + $0x10] sm:$0xff] %v1042_v40  ;;  %2180 = vst [vmem:[%s3746_s21 + $0x18] sm:$0xff] %v1043_v41  ;;  %v2937_v42 = vpack.c.bf16 %v1043_v41, %v1042_v40 }
 0x613   : > { %2938 = vmatprep.subr.bf16.mxu0 %v2937_v42 }
 0x614   : > { %2940 = vmatpush3.bf16.msra.mxu0 %v2937_v42 }
 0x615   : > { %2974 = vmatprep.subr.bf16.mxu0 %v2973_v46 }
 0x617   : > { %2575 = vmatmul.mubr.msk.f32.vlgmr.msra.gmra.mrb[6].mxu0 %vm397_vm0, %v3723_v12 }
 0x618   : > { %2976 = vmatpush3.bf16.msra.mxu0 %v2973_v46 }
 0x619   : > { %2978 = vmatprep.subr.bf16.mxu0 %v2977_v48 }
 0x61c   : > { %2980 = vmatpush3.bf16.msra.mxu0 %v2977_v48 }
 0x61d   : > { %2982 = vmatprep.subr.bf16.mxu0 %v2981_v51 }
 0x620   : > { %2984 = vmatpush3.bf16.msra.mxu0 %v2981_v51 }
 0x621   : > { %2986 = vmatprep.subr.bf16.mxu0 %v2985_v54 }
 0x624   : > { %2988 = vmatpush3.bf16.msra.mxu0 %v2985_v54 }
 0x625   : > { %2990 = vmatprep.subr.bf16.mxu0 %v2989_v58 }
 0x628   : > { %2992 = vmatpush3.bf16.msra.mxu0 %v2989_v58 }
 0x629   : > { %2994 = vmatprep.subr.bf16.mxu0 %v2993_v61 }
 0x62c   : > { %2996 = vmatpush3.bf16.msra.mxu0 %v2993_v61 }
 0x62d   : > { %2998 = vmatprep.subr.bf16.mxu0 %v2997_v0 }
 0x630   : > { %3000 = vmatpush3.bf16.msra.mxu0 %v2997_v0 }
 0x631   : > { %3002 = vmatprep.subr.bf16.mxu0 %v3001_v6 }
 0x634   : > { %3004 = vmatpush3.bf16.msra.mxu0 %v3001_v6 }
 0x635   : > { %3010 = vmatprep.subr.bf16.mxu0 %v3009_v17 }
 0x6ea   : > { %v2576_v1 = vpop.f32.mrb[6].mxu0 }
 0x6eb   : > { %v1113_v3 = vpop.f32.mrb[7].mxu0 }
 0x6ec   : > { %2609 = vmatprep.mubr.f32.mxu1 %v1113_v3 }
 0x6ed   : > { %2610 = vmatmul.mubr.f32.vlgmr.msra.gmra.mrb[6].mxu1 %v2576_v1 }
 0x6ee   : > { %2651 = vmatprep.mubr.msk.f32.mxu1 %vm397_vm0, %v3718_v2  ;;  %v1450_v2 = vld [vmem:[#allocation7 + $0x190] sm:$0xff] }
 0x6ef   : > { %v3013_v19 = vpack.c.bf16 %v1451_v18, %v1450_v2  ;;  %v1551_v18 = vld [vmem:[#allocation8 + $0x188] sm:$0xff] }
 0x7c0   : > { %v2611_v8 = vpop.f32.mrb[6].mxu1 }
 0x7c1   : > { %v1219_v9 = vadd.f32 %v2611_v8, %v2184_v7  ;;  %v1213_v10 = vpop.f32.mrb[7].mxu1 }
 0x7c2   : > { %v1214_v11 = vadd.f32 %v2184_v7, %v1213_v10  ;;  %v2188_v7 = vld [vmem:[%s3885_s7 + $0x2] sm:$0x1] }
 0x7c3   : > { %v1223_v14 = vmax.f32 %v1219_v9, 0.0 }
 0x7c4   : > { %v1222_v13 = vmax.f32 %v1214_v11, 0.0 }
 0x7c6   : > { %2644 = vmatprep.mubr.f32.mxu0 %v1222_v13 }
 0x7c7   : > { %2645 = vmatmul.mubr.f32.vlgmr.msra.gmra.mrb[8].mxu0 %v1223_v14 }
 0x7c8   : > { %3012 = vmatpush3.bf16.msra.mxu0 %v3009_v17  ;;  %v1550_v17 = vld [vmem:[#allocation8 + $0x180] sm:$0xff] }
 0x7c9   : > { %3014 = vmatprep.subr.bf16.mxu0 %v3013_v19  ;;  %v3041_v20 = vpack.c.bf16 %v1551_v18, %v1550_v17 }
 0x7cc   : > { %3016 = vmatpush3.bf16.msra.mxu0 %v3013_v19  ;;  %v1552_v19 = vld [vmem:[#allocation8 + $0x190] sm:$0xff] }
 0x7cd   : > { %3018 = vmatprep.subr.bf16.mxu0 %v3017_v22 }
 0x7d0   : > { %3020 = vmatpush3.bf16.msra.mxu0 %v3017_v22  ;;  %v3045_v22 = vpack.c.bf16 %v1553_v21, %v1552_v19 }
 0x7d1   : > { %3022 = vmatprep.subr.bf16.mxu0 %v3021_v25 }
 0x7d4   : > { %3024 = vmatpush3.bf16.msra.mxu0 %v3021_v25  ;;  %v3049_v25 = vpack.c.bf16 %v1555_v24, %v1554_v23 }
 0x7d5   : > { %3026 = vmatprep.subr.bf16.mxu0 %v3025_v28 }
 0x7d8   : > { %3028 = vmatpush3.bf16.msra.mxu0 %v3025_v28  ;;  %v3053_v28 = vpack.c.bf16 %v1557_v27, %v1556_v26 }
 0x7d9   : > { %3030 = vmatprep.subr.bf16.mxu0 %v3029_v31 }
 0x7dc   : > { %3032 = vmatpush3.bf16.msra.mxu0 %v3029_v31  ;;  %v1560_v31 = vld [vmem:[#allocation8 + $0x1d0] sm:$0xff] }
 0x7dd   : > { %3034 = vmatprep.subr.bf16.mxu0 %v3033_v34  ;;  %v3061_v33 = vpack.c.bf16 %v1561_v32, %v1560_v31 }
 0x7e0   : > { %3036 = vmatpush3.bf16.msra.mxu0 %v3033_v34  ;;  %v1562_v34 = vld [vmem:[#allocation8 + $0x1e0] sm:$0xff] }
 0x7e1   : > { %3038 = vmatprep.subr.bf16.mxu0 %v3037_v37  ;;  %v3065_v36 = vpack.c.bf16 %v1563_v35, %v1562_v34 }
 0x7e4   : > { %3040 = vmatpush3.bf16.msra.mxu0 %v3037_v37 }
 0x89a   : > { %v2646_v39 = vpop.f32.mrb[8].mxu0 }
 0x89b   : > { %v1321_v40 = vadd.f32 %v2646_v39, %v2186_v38  ;;  %v1315_v41 = vpop.f32.mrb[9].mxu0  ;;  %v3229_v39 = vld [vmem:[%s3698_s29] sm:$0xff] }
 0x89c   : > { %v1316_v42 = vadd.f32 %v2186_v38, %v1315_v41  ;;  %v1565_v41 = vld [vmem:[#allocation8 + $0x1f8] sm:$0xff] }
 0x89d   : > { %v1325_v43 = vmax.f32 %v1321_v40, 0.0  ;;  %v1564_v40 = vld [vmem:[#allocation8 + $0x1f0] sm:$0xff] }
 0x89e   : > { %v1324_v44 = vmax.f32 %v1316_v42, 0.0  ;;  %v3069_v42 = vpack.c.bf16 %v1565_v41, %v1564_v40 }
 0x89f   : > { %v1334_v45 = vmul.f32 %v1325_v43, %v1325_v43 }
 0x8a0   : > { %v1326_v46 = vadd.f32 %v1325_v43, %v1324_v44  ;;  %v1333_v47 = vmul.f32 %v1324_v44, %v1324_v44 }
 0x8a2   : > { %v1327_v48 = vrot.slane %v1326_v46, 4  ;;  %v1335_v49 = vadd.f32 %v1334_v45, %v1333_v47 }
 0x8a4   : > { %v1328_v50 = vadd.f32 %v1327_v48, %v1326_v46  ;;  %v1336_v51 = vrot.slane %v1335_v49, 4 }
 0x8a6   : > { %v1329_v52 = vrot.slane %v1328_v50, 2  ;;  %v1337_v53 = vadd.f32 %v1336_v51, %v1335_v49  ;;  %v1774_v51 = vld [vmem:[#allocation7 + $0x208] sm:$0xff] }
 0x8a8   : > { %v1330_v54 = vadd.f32 %v1329_v52, %v1328_v50  ;;  %v1338_v56 = vrot.slane %v1337_v53, 2  ;;  %v1773_v50 = vld [vmem:[#allocation7 + $0x200] sm:$0xff]  ;;  %v1775_v52 = vld [vmem:[#allocation7 + $0x210] sm:$0xff] }
 0x8aa   : > { %v1331_v57 = vrot.slane %v1330_v54, 1  ;;  %v1339_v58 = vadd.f32 %v1338_v56, %v1337_v53  ;;  %v3077_v53 = vpack.c.bf16 %v1774_v51, %v1773_v50 }
 0x8ac   : > { %v1332_v59 = vadd.f32 %v1331_v57, %v1330_v54  ;;  %v1340_v60 = vrot.slane %v1339_v58, 1  ;;  %v1776_v54 = vld [vmem:[#allocation7 + $0x218] sm:$0xff]  ;;  %v1777_v57 = vld [vmem:[#allocation7 + $0x220] sm:$0xff] }
 0x8ad   : > { %v3081_v56 = vpack.c.bf16 %v1776_v54, %v1775_v52  ;;  %v3230_v52 = vld [vmem:[%s3698_s29 + $0x8] sm:$0xff]  ;;  %s3353_s29 = scalar_lea.vmem %s3352_s15, 2560 }
 0x8ae   : > { %v1341_v61 = vadd.f32 %v1340_v60, %v1339_v58  ;;  %v1342_v62 = vmul.f32 0.0625, %v1332_v59  ;;  %v1778_v58 = vld [vmem:[#allocation7 + $0x228] sm:$0xff]  ;;  %v1779_v60 = vld [vmem:[#allocation7 + $0x230] sm:$0xff]  ;;  %p3355_p4 = scmp.lt.s32.totalorder %s3353_s29, %s3347_s11 }
 0x8af   : > { %v3085_v59 = vpack.c.bf16 %v1778_v58, %v1777_v57  ;;  %v1876_v54 = vld [vmem:[#allocation8 + $0x208] sm:$0xff]  ;;  %v1878_v58 = vld [vmem:[#allocation8 + $0x218] sm:$0xff] }
 0x8b0   : > { %v1343_v63 = vmul.f32 0.0625, %v1341_v61  ;;  %v1344_v0 = vmul.f32 %v1342_v62, %v1342_v62  ;;  %v1780_v61 = vld [vmem:[#allocation7 + $0x238] sm:$0xff]  ;;  %p3356_p8 = por %p3355_p4, %p3354_p1 }
 0x8b2   : > { %v1345_v1 = vsub.f32 %v1343_v63, %v1344_v0  ;;  %v1781_v63 = vld [vmem:[#allocation7 + $0x240] sm:$0xff]  ;;  %v1782_v0 = vld [vmem:[#allocation7 + $0x248] sm:$0xff]  ;;  %p3357_p11 = pnand %p3356_p8, %p3350_p5 }
 0x8b4   : > { %v1346_v3 = vadd.f32 1e-05, %v1345_v1  ;;  %v3093_v1 = vpack.c.bf16 %v1782_v0, %v1781_v63  ;;  %v1881_v63 = vld [vmem:[#allocation8 + $0x230] sm:$0xff]  ;;  %v1882_v0 = vld [vmem:[#allocation8 + $0x238] sm:$0xff] }
 0x8b6   : > { %3223 = vrsqrt.f32 %v1346_v3  ;;  %v1783_v3 = vld [vmem:[#allocation7 + $0x250] sm:$0xff] }
 0x8c0   : > { %v3224_v5 = vpop.eup %3223 }
 0x8c1   : > { %v1350_v6 = vmul.f32 %v3224_v5, %v2187_v4  ;;  %v1784_v4 = vld [vmem:[#allocation7 + $0x258] sm:$0xff] }
 0x8c2   : > { %v3097_v5 = vpack.c.bf16 %v1784_v4, %v1783_v3  ;;  %v1883_v3 = vld [vmem:[#allocation8 + $0x240] sm:$0xff]  ;;  %v1884_v4 = vld [vmem:[#allocation8 + $0x248] sm:$0xff] }
 0x8c3   : > { %v1353_v8 = vmul.f32 %v1350_v6, %v1342_v62  ;;  %v1358_v9 = vrot.slane %v1350_v6, %v3738_v55  ;;  %v3089_v62 = vpack.c.bf16 %v1780_v61, %v1779_v60  ;;  %v1785_v6 = vld [vmem:[#allocation7 + $0x260] sm:$0xff]  ;;  %v1880_v61 = vld [vmem:[#allocation8 + $0x228] sm:$0xff] }
 0x8c4   : > { %v1879_v60 = vld [vmem:[#allocation8 + $0x220] sm:$0xff] }
 0x8c5   : > { %v1359_v10 = vmul.f32 %v1358_v9, %v1324_v44  ;;  %v1354_v11 = vsub.f32 %v2188_v7, %v1353_v8  ;;  %v1360_v13 = vmul.f32 %v1358_v9, %v1325_v43  ;;  %v2194_v43 = vld [vmem:[%s3881_s3 + $0x3] ss:$0 sm:$0xff]  ;;  %v1786_v7 = vld [vmem:[#allocation7 + $0x268] sm:$0xff]  ;;  %v1787_v9 = vld [vmem:[#allocation7 + $0x270] sm:$0xff] }
 0x8c6   : > { %v3101_v8 = vpack.c.bf16 %v1786_v7, %v1785_v6  ;;  %v1885_v6 = vld [vmem:[#allocation8 + $0x250] sm:$0xff]  ;;  %v1886_v7 = vld [vmem:[#allocation8 + $0x258] sm:$0xff] }
 0x8c7   : > { %v1365_v14 = vrot.slane %v1354_v11, %v3738_v55 }
 0x8c9   : > { %v1367_v15 = vadd.f32 %v1365_v14, %v1359_v10  ;;  %v1368_v16 = vadd.f32 %v1365_v14, %v1360_v13  ;;  %v1788_v10 = vld [vmem:[#allocation7 + $0x278] sm:$0xff]  ;;  %v2196_v13 = vld [vmem:[%s3883_s5 + $0x3] ss:$0 sm:$0xff] }
 0x8ca   : > { %v3105_v11 = vpack.c.bf16 %v1788_v10, %v1787_v9  ;;  %v1887_v9 = vld [vmem:[#allocation8 + $0x260] sm:$0xff]  ;;  %v1888_v10 = vld [vmem:[#allocation8 + $0x268] sm:$0xff] }
 0x8cb   : > { %2189 = vst [vmem:[%s3746_s21 + $0x20] sm:$0xff] %v1367_v15  ;;  %2190 = vst [vmem:[%s3746_s21 + $0x28] sm:$0xff] %v1368_v16  ;;  %v3005_v2 = vpack.c.bf16 %v1368_v16, %v1367_v15 }
 0x8cd   : > { %3006 = vmatprep.subr.bf16.mxu1 %v3005_v2 }
 0x8ce   : > { %3008 = vmatpush3.bf16.msra.mxu1 %v3005_v2 }
 0x8cf   : > { %3042 = vmatprep.subr.bf16.mxu1 %v3041_v20 }
 0x8d1   : > { %2652 = vmatmul.mubr.msk.f32.vlgmr.msra.gmra.mrb[8].mxu1 %vm397_vm0, %v3723_v12  ;;  %v3057_v12 = vpack.c.bf16 %v1559_v30, %v1558_v29 }
 0x8d2   : > { %3044 = vmatpush3.bf16.msra.mxu1 %v3041_v20 }
 0x8d3   : > { %3046 = vmatprep.subr.bf16.mxu1 %v3045_v22 }
 0x8d6   : > { %3048 = vmatpush3.bf16.msra.mxu1 %v3045_v22 }
 0x8d7   : > { %3050 = vmatprep.subr.bf16.mxu1 %v3049_v25 }
 0x8da   : > { %3052 = vmatpush3.bf16.msra.mxu1 %v3049_v25 }
 0x8db   : > { %3054 = vmatprep.subr.bf16.mxu1 %v3053_v28 }
 0x8de   : > { %3056 = vmatpush3.bf16.msra.mxu1 %v3053_v28 }
 0x8df   : > { %3058 = vmatprep.subr.bf16.mxu1 %v3057_v12 }
 0x8e2   : > { %3060 = vmatpush3.bf16.msra.mxu1 %v3057_v12 }
 0x8e3   : > { %3062 = vmatprep.subr.bf16.mxu1 %v3061_v33 }
 0x8e6   : > { %3064 = vmatpush3.bf16.msra.mxu1 %v3061_v33 }
 0x8e7   : > { %3066 = vmatprep.subr.bf16.mxu1 %v3065_v36 }
 0x8ea   : > { %3068 = vmatpush3.bf16.msra.mxu1 %v3065_v36 }
 0x8eb   : > { %3070 = vmatprep.subr.bf16.mxu1 %v3069_v42 }
 0x8ee   : > { %3072 = vmatpush3.bf16.msra.mxu1 %v3069_v42  ;;  %v2198_v42 = vld [vmem:[%s3885_s7 + $0x3] sm:$0x1] }
 0x8ef   : > { %3078 = vmatprep.subr.bf16.mxu1 %v3077_v53 }
 0x9a4   : > { %v2653_v37 = vpop.f32.mrb[8].mxu1 }
 0x9a5   : > { %v1438_v38 = vpop.f32.mrb[9].mxu1 }
 0x9a6   : > { %2686 = vmatprep.mubr.f32.mxu0 %v1438_v38 }
 0x9a7   : > { %2687 = vmatmul.mubr.f32.vlgmr.msra.gmra.mrb[10].mxu0 %v2653_v37 }
 0x9a8   : > { %2728 = vmatprep.mubr.msk.f32.mxu0 %vm397_vm0, %v3229_v39  ;;  %v2197_v39 = vld [vmem:[%s3884_s6 + $0x3] sm:$0x1] }
 0xa7a   : > { %v2688_v44 = vpop.f32.mrb[10].mxu0 }
 0xa7b   : > { %v1544_v45 = vadd.f32 %v2688_v44, %v2194_v43  ;;  %v1538_v46 = vpop.f32.mrb[11].mxu0 }
 0xa7c   : > { %v1539_v47 = vadd.f32 %v2194_v43, %v1538_v46 }
 0xa7d   : > { %v1548_v49 = vmax.f32 %v1544_v45, 0.0 }
 0xa7e   : > { %v1547_v48 = vmax.f32 %v1539_v47, 0.0 }
 0xa80   : > { %2721 = vmatprep.mubr.f32.mxu1 %v1547_v48 }
 0xa81   : > { %2722 = vmatmul.mubr.f32.vlgmr.msra.gmra.mrb[10].mxu1 %v1548_v49 }
 0xa82   : > { %3080 = vmatpush3.bf16.msra.mxu1 %v3077_v53  ;;  %v1875_v53 = vld [vmem:[#allocation8 + $0x200] sm:$0xff] }
 0xa83   : > { %3082 = vmatprep.subr.bf16.mxu1 %v3081_v56  ;;  %v3109_v57 = vpack.c.bf16 %v1876_v54, %v1875_v53  ;;  %v2208_v54 = vld [vmem:[%s3885_s7 + $0x4] sm:$0x1] }
 0xa86   : > { %3084 = vmatpush3.bf16.msra.mxu1 %v3081_v56  ;;  %v1877_v56 = vld [vmem:[#allocation8 + $0x210] sm:$0xff] }
 0xa87   : > { %3086 = vmatprep.subr.bf16.mxu1 %v3085_v59 }
 0xa8a   : > { %3088 = vmatpush3.bf16.msra.mxu1 %v3085_v59  ;;  %v3113_v59 = vpack.c.bf16 %v1878_v58, %v1877_v56 }
 0xa8b   : > { %3090 = vmatprep.subr.bf16.mxu1 %v3089_v62 }
 0xa8e   : > { %3092 = vmatpush3.bf16.msra.mxu1 %v3089_v62  ;;  %v3117_v62 = vpack.c.bf16 %v1880_v61, %v1879_v60 }
 0xa8f   : > { %3094 = vmatprep.subr.bf16.mxu1 %v3093_v1 }
 0xa92   : > { %3096 = vmatpush3.bf16.msra.mxu1 %v3093_v1  ;;  %v3121_v1 = vpack.c.bf16 %v1882_v0, %v1881_v63 }
 0xa93   : > { %3098 = vmatprep.subr.bf16.mxu1 %v3097_v5 }
 0xa96   : > { %3100 = vmatpush3.bf16.msra.mxu1 %v3097_v5  ;;  %v3125_v5 = vpack.c.bf16 %v1884_v4, %v1883_v3 }
 0xa97   : > { %3102 = vmatprep.subr.bf16.mxu1 %v3101_v8 }
 0xa9a   : > { %3104 = vmatpush3.bf16.msra.mxu1 %v3101_v8  ;;  %v3129_v8 = vpack.c.bf16 %v1886_v7, %v1885_v6 }
 0xa9b   : > { %3106 = vmatprep.subr.bf16.mxu1 %v3105_v11 }
 0xa9e   : > { %3108 = vmatpush3.bf16.msra.mxu1 %v3105_v11  ;;  %v3133_v11 = vpack.c.bf16 %v1888_v10, %v1887_v9 }
 0xb54   : > { %v2723_v14 = vpop.f32.mrb[10].mxu1 }
 0xb55   : > { %v1646_v15 = vadd.f32 %v2723_v14, %v2196_v13  ;;  %v1640_v16 = vpop.f32.mrb[11].mxu1 }
 0xb56   : > { %v1641_v2 = vadd.f32 %v2196_v13, %v1640_v16  ;;  %v1890_v16 = vld [vmem:[#allocation8 + $0x278] sm:$0xff] }
 0xb57   : > { %v1650_v17 = vmax.f32 %v1646_v15, 0.0  ;;  %v1889_v15 = vld [vmem:[#allocation8 + $0x270] sm:$0xff] }
 0xb58   : > { %v1649_v18 = vmax.f32 %v1641_v2, 0.0  ;;  %v3137_v2 = vpack.c.bf16 %v1890_v16, %v1889_v15 }
 0xb59   : > { %v1659_v19 = vmul.f32 %v1650_v17, %v1650_v17 }
 0xb5a   : > { %v1651_v20 = vadd.f32 %v1650_v17, %v1649_v18  ;;  %v1658_v21 = vmul.f32 %v1649_v18, %v1649_v18 }
 0xb5c   : > { %v1652_v22 = vrot.slane %v1651_v20, 4  ;;  %v1660_v23 = vadd.f32 %v1659_v19, %v1658_v21 }
 0xb5e   : > { %v1653_v24 = vadd.f32 %v1652_v22, %v1651_v20  ;;  %v1661_v25 = vrot.slane %v1660_v23, 4 }
 0xb60   : > { %v1654_v26 = vrot.slane %v1653_v24, 2  ;;  %v1662_v27 = vadd.f32 %v1661_v25, %v1660_v23 }
 0xb62   : > { %v1655_v28 = vadd.f32 %v1654_v26, %v1653_v24  ;;  %v1663_v29 = vrot.slane %v1662_v27, 2  ;;  %v2206_v24 = vld [vmem:[%s3883_s5 + $0x4] ss:$0 sm:$0xff] }
 0xb64   : > { %v1656_v30 = vrot.slane %v1655_v28, 1  ;;  %v1664_v12 = vadd.f32 %v1663_v29, %v1662_v27 }
 0xb66   : > { %v1657_v31 = vadd.f32 %v1656_v30, %v1655_v28  ;;  %v1665_v32 = vrot.slane %v1664_v12, 1 }
 0xb68   : > { %v1666_v33 = vadd.f32 %v1665_v32, %v1664_v12  ;;  %v1667_v34 = vmul.f32 0.0625, %v1657_v31 }
 0xb6a   : > { %v1668_v35 = vmul.f32 0.0625, %v1666_v33  ;;  %v1669_v36 = vmul.f32 %v1667_v34, %v1667_v34 }
 0xb6c   : > { %v1670_v37 = vsub.f32 %v1668_v35, %v1669_v36 }
 0xb6e   : > { %v1671_v38 = vadd.f32 1e-05, %v1670_v37 }
 0xb70   : > { %3225 = vrsqrt.f32 %v1671_v38 }
 0xb7a   : > { %v3226_v40 = vpop.eup %3225 }
 0xb7b   : > { %v1675_v41 = vmul.f32 %v3226_v40, %v2197_v39 }
 0xb7d   : > { %v1678_v43 = vmul.f32 %v1675_v41, %v1667_v34  ;;  %v1683_v44 = vrot.slane %v1675_v41, %v3738_v55 }
 0xb7f   : > { %v1684_v45 = vmul.f32 %v1683_v44, %v1649_v18  ;;  %v1679_v46 = vsub.f32 %v2198_v42, %v1678_v43  ;;  %v1685_v47 = vmul.f32 %v1683_v44, %v1650_v17  ;;  %v2204_v17 = vld [vmem:[%s3881_s3 + $0x4] ss:$0 sm:$0xff] }
 0xb81   : > { %v1690_v48 = vrot.slane %v1679_v46, %v3738_v55 }
 0xb83   : > { %v1692_v49 = vadd.f32 %v1690_v48, %v1684_v45  ;;  %v1693_v50 = vadd.f32 %v1690_v48, %v1685_v47 }
 0xb85   : > { %2199 = vst [vmem:[%s3746_s21 + $0x30] sm:$0xff] %v1692_v49  ;;  %2200 = vst [vmem:[%s3746_s21 + $0x38] sm:$0xff] %v1693_v50  ;;  %v3073_v51 = vpack.c.bf16 %v1693_v50, %v1692_v49 }
 0xb87   : > { %3074 = vmatprep.subr.bf16.mxu0 %v3073_v51 }
 0xb88   : > { %3076 = vmatpush3.bf16.msra.mxu0 %v3073_v51  ;;  %v2207_v51 = vld [vmem:[%s3884_s6 + $0x4] sm:$0x1] }
 0xb89   : > { %3110 = vmatprep.subr.bf16.mxu0 %v3109_v57 }
 0xb8b   : > { %2729 = vmatmul.mubr.msk.f32.vlgmr.msra.gmra.mrb[12].mxu0 %vm397_vm0, %v3230_v52 }
 0xb8c   : > { %3112 = vmatpush3.bf16.msra.mxu0 %v3109_v57 }
 0xb8d   : > { %3114 = vmatprep.subr.bf16.mxu0 %v3113_v59 }
 0xb90   : > { %3116 = vmatpush3.bf16.msra.mxu0 %v3113_v59 }
 0xb91   : > { %3118 = vmatprep.subr.bf16.mxu0 %v3117_v62 }
 0xb94   : > { %3120 = vmatpush3.bf16.msra.mxu0 %v3117_v62 }
 0xb95   : > { %3122 = vmatprep.subr.bf16.mxu0 %v3121_v1 }
 0xb98   : > { %3124 = vmatpush3.bf16.msra.mxu0 %v3121_v1 }
 0xb99   : > { %3126 = vmatprep.subr.bf16.mxu0 %v3125_v5 }
 0xb9c   : > { %3128 = vmatpush3.bf16.msra.mxu0 %v3125_v5 }
 0xb9d   : > { %3130 = vmatprep.subr.bf16.mxu0 %v3129_v8 }
 0xba0   : > { %3132 = vmatpush3.bf16.msra.mxu0 %v3129_v8 }
 0xba1   : > { %3134 = vmatprep.subr.bf16.mxu0 %v3133_v11 }
 0xba4   : > { %3136 = vmatpush3.bf16.msra.mxu0 %v3133_v11 }
 0xba5   : > { %3138 = vmatprep.subr.bf16.mxu0 %v3137_v2 }
 0xba8   : > { %3140 = vmatpush3.bf16.msra.mxu0 %v3137_v2 }
 0xc5e   : > { %v2730_v13 = vpop.f32.mrb[12].mxu0 }
 0xc5f   : > { %v1763_v14 = vpop.f32.mrb[13].mxu0 }
 0xc60   : > { %2763 = vmatprep.mubr.f32.mxu1 %v1763_v14 }
 0xc61   : > { %2764 = vmatmul.mubr.f32.vlgmr.msra.gmra.mrb[12].mxu1 %v2730_v13 }
 0xd34   : > { %v2765_v18 = vpop.f32.mrb[12].mxu1 }
 0xd35   : > { %v1869_v19 = vadd.f32 %v2765_v18, %v2204_v17  ;;  %v1863_v20 = vpop.f32.mrb[13].mxu1 }
 0xd36   : > { %v1864_v21 = vadd.f32 %v2204_v17, %v1863_v20 }
 0xd37   : > { %v1873_v23 = vmax.f32 %v1869_v19, 0.0 }
 0xd38   : > { %v1872_v22 = vmax.f32 %v1864_v21, 0.0 }
 0xd3a   : > { %2798 = vmatprep.mubr.f32.mxu0 %v1872_v22 }
 0xd3b   : > { %2799 = vmatmul.mubr.f32.vlgmr.msra.gmra.mrb[14].mxu0 %v1873_v23 }
 0xe0e   : > { %v2800_v25 = vpop.f32.mrb[14].mxu0 }
 0xe0f   : > { %v1971_v26 = vadd.f32 %v2800_v25, %v2206_v24  ;;  %v1965_v27 = vpop.f32.mrb[15].mxu0 }
 0xe10   : > { %v1966_v28 = vadd.f32 %v2206_v24, %v1965_v27 }
 0xe11   : > { %v1975_v29 = vmax.f32 %v1971_v26, 0.0 }
 0xe12   : > { %v1974_v30 = vmax.f32 %v1966_v28, 0.0 }
 0xe13   : > { %v1984_v12 = vmul.f32 %v1975_v29, %v1975_v29 }
 0xe14   : > { %v1976_v31 = vadd.f32 %v1975_v29, %v1974_v30  ;;  %v1983_v32 = vmul.f32 %v1974_v30, %v1974_v30 }
 0xe16   : > { %v1977_v33 = vrot.slane %v1976_v31, 4  ;;  %v1985_v34 = vadd.f32 %v1984_v12, %v1983_v32 }
 0xe18   : > { %v1978_v35 = vadd.f32 %v1977_v33, %v1976_v31  ;;  %v1986_v36 = vrot.slane %v1985_v34, 4 }
 0xe1a   : > { %v1979_v37 = vrot.slane %v1978_v35, 2  ;;  %v1987_v38 = vadd.f32 %v1986_v36, %v1985_v34 }
 0xe1c   : > { %v1980_v39 = vadd.f32 %v1979_v37, %v1978_v35  ;;  %v1988_v40 = vrot.slane %v1987_v38, 2 }
 0xe1e   : > { %v1981_v41 = vrot.slane %v1980_v39, 1  ;;  %v1989_v42 = vadd.f32 %v1988_v40, %v1987_v38 }
 0xe20   : > { %v1982_v43 = vadd.f32 %v1981_v41, %v1980_v39  ;;  %v1990_v44 = vrot.slane %v1989_v42, 1 }
 0xe22   : > { %v1991_v45 = vadd.f32 %v1990_v44, %v1989_v42  ;;  %v1992_v46 = vmul.f32 0.0625, %v1982_v43 }
 0xe24   : > { %v1993_v47 = vmul.f32 0.0625, %v1991_v45  ;;  %v1994_v48 = vmul.f32 %v1992_v46, %v1992_v46 }
 0xe26   : > { %v1995_v49 = vsub.f32 %v1993_v47, %v1994_v48 }
 0xe28   : > { %v1996_v50 = vadd.f32 1e-05, %v1995_v49 }
 0xe2a   : > { %3227 = vrsqrt.f32 %v1996_v50 }
 0xe34   : > { %v3228_v52 = vpop.eup %3227 }
 0xe35   : > { %v2000_v53 = vmul.f32 %v3228_v52, %v2207_v51 }
 0xe37   : > { %v2003_v56 = vmul.f32 %v2000_v53, %v1992_v46  ;;  %v2008_v57 = vrot.slane %v2000_v53, %v3738_v55 }
 0xe39   : > { %v2004_v58 = vsub.f32 %v2208_v54, %v2003_v56  ;;  %v2009_v59 = vmul.f32 %v2008_v57, %v1974_v30  ;;  %v2010_v60 = vmul.f32 %v2008_v57, %v1975_v29 }
 0xe3b   : > { %v2015_v61 = vrot.slane %v2004_v58, %v3738_v55 }
 0xe3d   : > { %v2017_v62 = vadd.f32 %v2015_v61, %v2009_v59  ;;  %v2018_v63 = vadd.f32 %v2015_v61, %v2010_v60 }
 0xe3f   : > { %2209 = vst [vmem:[%s3746_s21 + $0x40] sm:$0xff] %v2017_v62  ;;  %2210 = vst [vmem:[%s3746_s21 + $0x48] sm:$0xff] %v2018_v63 }
 0xe40   : > { %3360 = shalt.err (!%p3357_p11)
}
 0xe41   : > { %s3361_s21 = scalar_lea.hbm %s3831_s20, 1280  ;;  %s3365_s23 = scalar_lea.hbm %s3886_s8, 10240 }
 0xe42   : > { %p3362_p0 = scmp.ne.s32.totalorder %s3831_s20, %s3361_s21  ;;  %p3366_p13 = scmp.lt.u32.totalorder %s3831_s20, %s3886_s8 }
 0xe43   : > { %p3367_p3 = scmp.lt.u32.totalorder %s3365_s23, %s3361_s21  ;;  %p3369_p9 = scmp.lt.u32.totalorder %s3361_s21, %s3831_s20 }
 0xe44   : > { %p3363_p2 = pnand %p3362_p0, %p3599_p6 }
 0xe45   : > { %p3368_p7 = por %p3367_p3, %p3366_p13 }
 0xe46   : > { %p3364_p10 = pneg %p3363_p2 }
 0xe47   : > { %p3370_p12 = por %p3369_p9, %p3368_p7 }
 0xe49   : > { %p3371_p5 = pnand %p3370_p12, %p3364_p10 }
 0xe4b   : > { %3374 = shalt.err (!%p3371_p5)
}
 0xe4c   : > { %s3434_s17 = smov 128   ;;  %s3435_s0 = smov 8  }
 0xe4d   : > { %3155 = dma.vmem_to_hbm [thread:$0]  (%p3599_p6), %s3833_s24, 1280, %s3831_s20, %s2023_s9, %s3434_s17, %s3434_s17, %s3435_s0  }
 0xe4e PF: > { %p3180_p1 = scmp.ge.s32.totalorder %s3425_s30, 2  ;;  %s2051_s18 = sand.u32 1, %s3413_s27  }
 0xe4f   : > { %p3918_p4 = scmp.ne.s32.totalorder %s3900_s12, 0  ;;  %s2052_s2 = scalar_lea.sflag [#allocation4], %s2051_s18 }
 0xe51   : > { %p3172_p8 = pnand %p3180_p1, %p3918_p4 }
 0xe53   : > { %3408 = dma.done.wait (!%p3172_p8), %s2052_s2, 1280  }
 0xe54   : > { %3410 = vsyncadd (!%p3172_p8), %s2052_s2, 4294966016  ;;  %s3919_s13 = sld [smem:[#allocation16_spill]]  ;;  %s3920_s29 = sld [smem:[#allocation17_spill]] }
 0xe55   : > { %p25_p11 = scmp.ge.s32.totalorder %s3589_s16, 10   ;;  %s3921_s27 = smov %s3417_s28 }
 0xe56   : > { %s3923_s30 = smov %s3589_s16 }
 0xe57   :  { %27 = sbr.rel (!%p25_p11) target bundleno = 12 (0xc), region = 146 }
 0xe5a   : > { %s3922_s28 = smov %s3919_s13 }
 0xe5e   :  { %2057 = vsyncpa [#allocation3], 1 }
 0xe5f   :  { %2059 = vsyncpa [#allocation3 + $0x1], 1 }
 0xe60   :  { %2060 = vsyncpa [#allocation6], 1 }
 0xe61   :  { %2062 = vsyncpa [#allocation6 + $0x1], 1 }
 0xe62   :  { %2063 = vsyncpa [#allocation9], 1 }
 0xe63   :  { %2064 = vsyncpa [#allocation4], 1 }
 0xe64   :  { %2066 = vsyncpa [#allocation4 + $0x1], 1 }

</bundles_post_ra>
